<compile_context>
chip_gen: v5e
topology: v5e:2x2
jax: 0.10.0
libtpu: 0.0.40
codegen_flags: <defaults>
</compile_context>

<pallas_src>
import functools
import math

import numpy as np

import jax
import jax.numpy as jnp
from jax.experimental import pallas as pl
from jax.experimental.pallas import tpu as pltpu

H_PAD = 128                       # hidden dim padded to one full lane group
_CONV_TILE = 512                  # A-tile target (512x512 bf16 = 512 KiB/block)
_READOUT_TILE = 256               # node tile for the readout reduction
_VMEM_LIMIT = 32 * 1024 * 1024    # safe on v5e/v6e (128 MiB) and v7x (64 MiB)


# ---------------------------------------------------------------------------
# small helpers
# ---------------------------------------------------------------------------

def _round_up(v, m):
    return (v + m - 1) // m * m


def _tiles(n, target):
    """Return (n_pad, tile): tile | n_pad, both multiples of 128."""
    n128 = _round_up(max(int(n), 1), 128)
    if n128 <= target:
        return n128, n128
    return _round_up(n128, target), target


def _tile_with_self_loops(a_ref, i, k):
    """Upcast the bf16 A tile to f32 and add the (global) diagonal self-loops."""
    tm, tk = a_ref.shape
    a = a_ref[...].astype(jnp.float32)
    rows = i * tm + jax.lax.broadcasted_iota(jnp.int32, (tm, tk), 0)
    cols = k * tk + jax.lax.broadcasted_iota(jnp.int32, (tm, tk), 1)
    return a + (rows == cols).astype(jnp.float32)


# ---------------------------------------------------------------------------
# Pallas kernels
# ---------------------------------------------------------------------------

def _gcn_conv_kernel(a_ref, xw_ref, dinv_ref, b_ref, o_ref, acc_ref, *, relu):
    """o = relu( dinv_r * ((A + I) @ XW) + b ); XW already carries dinv_c."""
    k = pl.program_id(1)

    @pl.when(k == 0)
    def _():
        acc_ref[...] = jnp.zeros_like(acc_ref)

    a = _tile_with_self_loops(a_ref, pl.program_id(0), k)
    acc_ref[...] += jnp.dot(a, xw_ref[...], preferred_element_type=jnp.float32)

    @pl.when(k == pl.num_programs(1) - 1)
    def _():
        out = acc_ref[...] * dinv_ref[...] + b_ref[...]
        if relu:
            out = jnp.maximum(out, 0.0)
        o_ref[...] = out


def _score_gate_kernel(a_ref, spre_ref, h_ref, dinv_ref, bs_ref, o_ref,
                       acc_ref, *, nhid):
    """SAGPool score conv fused with the tanh gate.

    score = dinv_r * ((A + I) @ spre) + bs      (spre = dinv_c * (H @ Ws))
    slab  = H * tanh(score), with the raw score stashed in column `nhid`.
    """
    i = pl.program_id(0)
    k = pl.program_id(1)

    @pl.when(k == 0)
    def _():
        acc_ref[...] = jnp.zeros_like(acc_ref)

    a = _tile_with_self_loops(a_ref, i, k)
    # (A+I) @ spre with spre a [1, tk] row vector -> VPU mul + lane reduce.
    acc_ref[...] += jnp.sum(a * spre_ref[...], axis=1, keepdims=True)

    @pl.when(k == pl.num_programs(1) - 1)
    def _():
        s = acc_ref[...] * dinv_ref[...] + bs_ref[...]        # [tm, 1]
        gated = h_ref[...] * jnp.tanh(s)                       # [tm, H_PAD]
        col_ids = jax.lax.broadcasted_iota(jnp.int32, gated.shape, 1)
        o_ref[...] = jnp.where(col_ids == nhid, s, gated)      # lane-dense slab


def _readout_kernel(x_ref, m_ref, cnt_ref, o_ref, max_ref, sum_ref):
    """cat([gmp(x, batch), gap(x, batch)], dim=1), tiled over nodes."""
    k = pl.program_id(0)

    @pl.when(k == 0)
    def _():
        max_ref[...] = jnp.full_like(max_ref, -jnp.inf)
        sum_ref[...] = jnp.zeros_like(sum_ref)

    x = x_ref[...]                                      # [tile, H_PAD]
    m = m_ref[...]                                      # [g_pad, tile]
    sum_ref[...] += jnp.dot(m, x, preferred_element_type=jnp.float32)
    masked = jnp.where(m[:, :, None] > 0.0, x[None, :, :], -jnp.inf)
    max_ref[...] = jnp.maximum(max_ref[...], jnp.max(masked, axis=1))

    @pl.when(k == pl.num_programs(0) - 1)
    def _():
        mean = sum_ref[...] * pl.reciprocal(cnt_ref[...], approx=True)
        o_ref[...] = jnp.concatenate([max_ref[...], mean], axis=1)


# ---------------------------------------------------------------------------
# kernel wrappers
# ---------------------------------------------------------------------------

def gcn_conv(a_pad, xw_pad, dinv_col, bias_row, *, tile, relu):
    n_pad = a_pad.shape[0]
    grid = (n_pad // tile, n_pad // tile)
    return pl.pallas_call(
        functools.partial(_gcn_conv_kernel, relu=relu),
        out_shape=jax.ShapeDtypeStruct((n_pad, H_PAD), jnp.float32),
        grid_spec=pltpu.PrefetchScalarGridSpec(
            num_scalar_prefetch=0,
            grid=grid,
            in_specs=[
                pl.BlockSpec((tile, tile), lambda i, k: (i, k)),   # A
                pl.BlockSpec((tile, H_PAD), lambda i, k: (k, 0)),  # XW
                pl.BlockSpec((tile, 1), lambda i, k: (i, 0)),      # dinv rows
                pl.BlockSpec((1, H_PAD), lambda i, k: (0, 0)),     # bias
            ],
            out_specs=pl.BlockSpec((tile, H_PAD), lambda i, k: (i, 0)),
            scratch_shapes=[pltpu.VMEM((tile, H_PAD), jnp.float32)],
        ),
        compiler_params=pltpu.CompilerParams(
            dimension_semantics=("parallel", "arbitrary"),
            vmem_limit_bytes=_VMEM_LIMIT,
        ),
        cost_estimate=pl.CostEstimate(
            flops=2 * n_pad * n_pad * H_PAD,
            transcendentals=0,
            bytes_accessed=2 * n_pad * n_pad + 3 * 4 * n_pad * H_PAD,
        ),
    )(a_pad, xw_pad, dinv_col, bias_row)


def sag_score_gate(a_pad, spre_row, h_pad, dinv_col, bias_s, *, tile, nhid):
    n_pad = a_pad.shape[0]
    grid = (n_pad // tile, n_pad // tile)
    return pl.pallas_call(
        functools.partial(_score_gate_kernel, nhid=nhid),
        out_shape=jax.ShapeDtypeStruct((n_pad, H_PAD), jnp.float32),
        grid_spec=pltpu.PrefetchScalarGridSpec(
            num_scalar_prefetch=0,
            grid=grid,
            in_specs=[
                pl.BlockSpec((tile, tile), lambda i, k: (i, k)),   # A
                pl.BlockSpec((1, tile), lambda i, k: (0, k)),      # spre row
                pl.BlockSpec((tile, H_PAD), lambda i, k: (i, 0)),  # H (for gate)
                pl.BlockSpec((tile, 1), lambda i, k: (i, 0)),      # dinv rows
                pl.BlockSpec((1, 1), lambda i, k: (0, 0)),         # score bias
            ],
            out_specs=pl.BlockSpec((tile, H_PAD), lambda i, k: (i, 0)),
            scratch_shapes=[pltpu.VMEM((tile, 1), jnp.float32)],
        ),
        compiler_params=pltpu.CompilerParams(
            dimension_semantics=("parallel", "arbitrary"),
            vmem_limit_bytes=_VMEM_LIMIT,
        ),
    )(a_pad, spre_row, h_pad, dinv_col, bias_s)


def _readout_mask(counts, k_pad, g_pad):
    m = np.zeros((g_pad, k_pad), np.float32)
    off = 0
    for gi, c in enumerate(counts):
        m[gi, off:off + c] = 1.0
        off += c
    return jnp.asarray(m)


def _readout_counts(counts, g_pad):
    c = np.ones((g_pad, 1), np.float32)
    c[:len(counts), 0] = np.asarray(counts, np.float32)
    return jnp.asarray(c)


def graph_readout(x_kept, counts):
    g = len(counts)
    g_pad = _round_up(g, 8)
    k_real = x_kept.shape[0]
    k_pad, tile = _tiles(k_real, _READOUT_TILE)
    x_p = jnp.pad(x_kept, ((0, k_pad - k_real), (0, 0)))
    mask = _readout_mask(counts, k_pad, g_pad)       # static constant, no scatter
    cnt = _readout_counts(counts, g_pad)
    out = pl.pallas_call(
        _readout_kernel,
        out_shape=jax.ShapeDtypeStruct((g_pad, 2 * H_PAD), jnp.float32),
        grid_spec=pltpu.PrefetchScalarGridSpec(
            num_scalar_prefetch=0,
            grid=(k_pad // tile,),
            in_specs=[
                pl.BlockSpec((tile, H_PAD), lambda k: (k, 0)),
                pl.BlockSpec((g_pad, tile), lambda k: (0, k)),
                pl.BlockSpec((g_pad, 1), lambda k: (0, 0)),
            ],
            out_specs=pl.BlockSpec((g_pad, 2 * H_PAD), lambda k: (0, 0)),
            scratch_shapes=[pltpu.VMEM((g_pad, H_PAD), jnp.float32),
                            pltpu.VMEM((g_pad, H_PAD), jnp.float32)],
        ),
        compiler_params=pltpu.CompilerParams(
            dimension_semantics=("arbitrary",),
            vmem_limit_bytes=_VMEM_LIMIT,
        ),
    )(x_p, mask, cnt)
    return out[:g]


# ---------------------------------------------------------------------------
# plain-JAX glue (data-dependent top-k / gathers) and parameters
# ---------------------------------------------------------------------------

def _sag_topk(score, counts, ratio):
    """Per-graph top-k (k = ceil(ratio * n_g)), like torch_geometric's topk()."""
    perms, kept = [], []
    off = 0
    for c in counts:
        kk = max(1, int(math.ceil(ratio * c)))      # ceil => never an empty graph
        _, idx = jax.lax.top_k(score[off:off + c], kk)
        perms.append(idx.astype(jnp.int32) + off)
        kept.append(kk)
        off += c
    return jnp.concatenate(perms), tuple(kept)


def init_params(key, num_features, nhid):
    def glorot(k, shape):
        lim = math.sqrt(6.0 / (shape[0] + shape[1]))
        return jax.random.uniform(k, shape, jnp.float32, -lim, lim)

    ks = jax.random.split(key, 6)
    params = {}
    dims = [(num_features, nhid), (nhid, nhid), (nhid, nhid)]
    for i, (din, dout) in enumerate(dims, start=1):
        w = glorot(ks[2 * (i - 1)], (din, dout))
        ws = glorot(ks[2 * (i - 1) + 1], (nhid, 1))        # SAGPool score layer
        din_p = din if i == 1 else H_PAD                   # layers 2/3 eat padded slabs
        params[f"w{i}"] = jnp.zeros((din_p, H_PAD), jnp.float32).at[:din, :dout].set(w)
        params[f"b{i}"] = jnp.zeros((1, H_PAD), jnp.float32)
        params[f"ws{i}"] = jnp.zeros((H_PAD, 1), jnp.float32).at[:nhid, :].set(ws)
        params[f"bs{i}"] = jnp.zeros((1, 1), jnp.float32)
    return params


def graph_encoder_forward(params, x, edge_index, *, counts, pooling_ratio, nhid):
    counts = tuple(int(c) for c in counts)                 # static graph sizes
    n0 = x.shape[0]
    adj = jnp.zeros((n0, n0), jnp.float32).at[edge_index[0], edge_index[1]].set(1.0)

    feat = x
    readouts = []
    for layer in (1, 2, 3):
        n_real = feat.shape[0]
        n_pad, tile = _tiles(n_real, _CONV_TILE)
        pad = n_pad - n_real

        # per-layer GCN normalization terms (A is symmetric here)
        deg = jnp.sum(adj, axis=1) + 1.0                   # self-loop degrees
        dinv = jax.lax.rsqrt(deg)
        dinv_pad = jnp.pad(dinv, (0, pad), constant_values=1.0)
        dinv_col = dinv_pad[:, None]                       # [n_pad, 1]
        a_pad = jnp.pad(adj, ((0, pad), (0, pad))).astype(jnp.bfloat16)

        # small feature transform (column D^-1/2 folded into X), then the heavy
        # A @ XW matmul + bias + ReLU fused in the Pallas conv kernel
        xw = (feat * dinv[:, None]) @ params[f"w{layer}"]  # [n_real, H_PAD]
        xw_pad = jnp.pad(xw, ((0, pad), (0, 0)))
        h = gcn_conv(a_pad, xw_pad, dinv_col, params[f"b{layer}"],
                     tile=tile, relu=True)                 # [n_pad, H_PAD]

        # SAGPool: score = GCNConv(nhid, 1)(h), fused with x * tanh(score)
        spre_row = ((h @ params[f"ws{layer}"])[:, 0] * dinv_pad)[None, :]
        slab = sag_score_gate(a_pad, spre_row, h, dinv_col, params[f"bs{layer}"],
                              tile=tile, nhid=nhid)        # [n_pad, H_PAD]

        slab = slab[:n_real]
        score = slab[:, nhid]
        perm, counts = _sag_topk(score, counts, pooling_ratio)
        feat = jnp.take(slab, perm, axis=0)                # gated kept nodes
        adj = jnp.take(jnp.take(adj, perm, axis=0), perm, axis=1)  # filter_adj

        # x_i = cat([gmp(x, batch), gap(x, batch)], dim=1)
        readouts.append(graph_readout(feat, counts))       # [G, 2*H_PAD]

    summed = readouts[0] + readouts[1] + readouts[2]       # tiny: plain jnp
    out = jnp.concatenate([summed[:, :nhid], summed[:, H_PAD:H_PAD + nhid]],
                          axis=1)
    # TODO(synk): variational branch (mu / log_var Linear heads) not implemented
    # (args.variational=False path).
    return out


# ---------------------------------------------------------------------------
# example run
# ---------------------------------------------------------------------------

if __name__ == "__main__":
    num_features, nhid = 16, 32
    pooling_ratio = 0.5
    graph_sizes = (12, 20)
    N = sum(graph_sizes)

    key = jax.random.PRNGKey(0)
    kx, ka, kp = jax.random.split(key, 3)

    # node features
    x = jax.random.normal(kx, (N, num_features), jnp.float32)

    # deterministic block-diagonal undirected random graph -> edge_index
    u = np.asarray(jax.random.uniform(ka, (N, N)))
    block = np.zeros((N, N), bool)
    off = 0
    for c in graph_sizes:
        block[off:off + c, off:off + c] = True
        off += c
    upper = np.triu(np.ones((N, N), bool), k=1)
    a_up = (u < 0.3) & block & upper
    a_sym = a_up | a_up.T
    src, dst = np.nonzero(a_sym)
    edge_index = jnp.asarray(np.stack([src, dst]), jnp.int32)

    params = init_params(kp, num_features, nhid)
    fwd = jax.jit(functools.partial(graph_encoder_forward,
                                    counts=graph_sizes,
                                    pooling_ratio=pooling_ratio,
                                    nhid=nhid))
    out = jax.block_until_ready(fwd(params, x, edge_index))
    assert out.shape == (len(graph_sizes), 2 * nhid)
    assert bool(jnp.all(jnp.isfinite(out)))
    print("KERNEL_OK")
</pallas_src>

<mosaic_0001>
module attributes {stable_mosaic.version = 11 : i64} {
  func.func @_gcn_conv_kernel(%arg0: i32, %arg1: i32, %arg2: memref<128x128xbf16, #tpu.memory_space<vmem>>, %arg3: memref<128x128xf32, #tpu.memory_space<vmem>>, %arg4: memref<128x1xf32, #tpu.memory_space<vmem>>, %arg5: memref<1x128xf32, #tpu.memory_space<vmem>>, %arg6: memref<128x128xf32, #tpu.memory_space<vmem>>, %arg7: memref<128x128xf32, #tpu.memory_space<vmem>>) attributes {dimension_semantics = [#tpu.dimension_semantics<parallel>, #tpu.dimension_semantics<arbitrary>], iteration_bounds = array<i64: 1, 1>, scalar_prefetch = 0 : i64, scratch_operands = 1 : i64, tpu.core_type = #tpu.core_type<tc>, window_params = [{transform_indices = @transform_0, window_bounds = array<i64: 128, 128>}, {transform_indices = @transform_1, window_bounds = array<i64: 128, 128>}, {transform_indices = @transform_2, window_bounds = array<i64: 128, 1>}, {pipeline_mode = #tpu.pipeline_mode<synchronous>, transform_indices = @transform_3, window_bounds = array<i64: 1, 128>}, {transform_indices = @transform_4, window_bounds = array<i64: 128, 128>}]} {
    %c0_i32 = arith.constant 0 : i32
    %0 = arith.cmpi eq, %arg1, %c0_i32 : i32
    %1 = arith.extui %0 : i1 to i32
    %c0_i32_0 = arith.constant 0 : i32
    %2 = arith.cmpi ne, %1, %c0_i32_0 : i32
    scf.if %2 {
      %cst_11 = arith.constant 0.000000e+00 : f32
      %25 = vector.broadcast %cst_11 : f32 to vector<128x128xf32>
      %c0_12 = arith.constant 0 : index
      %c0_13 = arith.constant 0 : index
      %26 = vector.load %arg7[%c0_12, %c0_13] : memref<128x128xf32, #tpu.memory_space<vmem>>, vector<128x128xf32>
      tpu.vector_store %arg7[%c0_12, %c0_13], %25 {strides = array<i32>} : memref<128x128xf32, #tpu.memory_space<vmem>>, vector<128x128xf32>,
    } else {
    }
    %c0 = arith.constant 0 : index
    %c0_1 = arith.constant 0 : index
    %3 = vector.load %arg2[%c0, %c0_1] : memref<128x128xbf16, #tpu.memory_space<vmem>>, vector<128x128xbf16>
    %4 = arith.extf %3 : vector<128x128xbf16> to vector<128x128xf32>
    %c128_i32 = arith.constant 128 : i32
    %5 = arith.muli %arg0, %c128_i32 : i32
    %6 = tpu.iota {dimensions = array<i32: 0>} : vector<128x128xi32>
    %7 = vector.broadcast %5 : i32 to vector<128x128xi32>
    %8 = arith.addi %7, %6 : vector<128x128xi32>
    %c128_i32_2 = arith.constant 128 : i32
    %9 = arith.muli %arg1, %c128_i32_2 : i32
    %10 = tpu.iota {dimensions = array<i32: 1>} : vector<128x128xi32>
    %11 = vector.broadcast %9 : i32 to vector<128x128xi32>
    %12 = arith.addi %11, %10 : vector<128x128xi32>
    %13 = arith.cmpi eq, %8, %12 : vector<128x128xi32>
    %14 = arith.extui %13 : vector<128x128xi1> to vector<128x128xi32>
    %15 = arith.sitofp %14 : vector<128x128xi32> to vector<128x128xf32>
    %16 = arith.addf %4, %15 : vector<128x128xf32>
    %c0_3 = arith.constant 0 : index
    %c0_4 = arith.constant 0 : index
    %17 = vector.load %arg7[%c0_3, %c0_4] : memref<128x128xf32, #tpu.memory_space<vmem>>, vector<128x128xf32>
    %c0_5 = arith.constant 0 : index
    %c0_6 = arith.constant 0 : index
    %18 = vector.load %arg3[%c0_5, %c0_6] : memref<128x128xf32, #tpu.memory_space<vmem>>, vector<128x128xf32>
    %cst = arith.constant dense<0.000000e+00> : vector<128x128xf32>
    %19 = tpu.matmul %16, %18, %cst {dimension_numbers = #tpu.dot_dimension_numbers<[1], [0], [0], [1], [0, 0, 1, 1], [], []>} : vector<128x128xf32>, vector<128x128xf32>, vector<128x128xf32> -> vector<128x128xf32>
    %20 = arith.addf %17, %19 : vector<128x128xf32>
    %c0_7 = arith.constant 0 : index
    %c0_8 = arith.constant 0 : index
    %21 = vector.load %arg7[%c0_7, %c0_8] : memref<128x128xf32, #tpu.memory_space<vmem>>, vector<128x128xf32>
    tpu.vector_store %arg7[%c0_7, %c0_8], %20 {strides = array<i32>} : memref<128x128xf32, #tpu.memory_space<vmem>>, vector<128x128xf32>,
    %c0_i32_9 = arith.constant 0 : i32
    %22 = arith.cmpi eq, %arg1, %c0_i32_9 : i32
    %23 = arith.extui %22 : i1 to i32
    %c0_i32_10 = arith.constant 0 : i32
    %24 = arith.cmpi ne, %23, %c0_i32_10 : i32
    scf.if %24 {
      %c0_11 = arith.constant 0 : index
      %c0_12 = arith.constant 0 : index
      %25 = vector.load %arg7[%c0_11, %c0_12] : memref<128x128xf32, #tpu.memory_space<vmem>>, vector<128x128xf32>
      %c0_13 = arith.constant 0 : index
      %c0_14 = arith.constant 0 : index
      %26 = vector.load %arg4[%c0_13, %c0_14] : memref<128x1xf32, #tpu.memory_space<vmem>>, vector<128x1xf32>
      %27 = vector.broadcast %26 : vector<128x1xf32> to vector<128x128xf32>
      %28 = arith.mulf %25, %27 : vector<128x128xf32>
      %c0_15 = arith.constant 0 : index
      %c0_16 = arith.constant 0 : index
      %29 = vector.load %arg5[%c0_15, %c0_16] : memref<1x128xf32, #tpu.memory_space<vmem>>, vector<1x128xf32>
      %30 = vector.broadcast %29 : vector<1x128xf32> to vector<128x128xf32>
      %31 = arith.addf %28, %30 : vector<128x128xf32>
      %cst_17 = arith.constant 0.000000e+00 : f32
      %32 = vector.broadcast %cst_17 : f32 to vector<128x128xf32>
      %33 = arith.maximumf %31, %32 : vector<128x128xf32>
      %c0_18 = arith.constant 0 : index
      %c0_19 = arith.constant 0 : index
      %34 = vector.load %arg6[%c0_18, %c0_19] : memref<128x128xf32, #tpu.memory_space<vmem>>, vector<128x128xf32>
      tpu.vector_store %arg6[%c0_18, %c0_19], %33 {strides = array<i32>} : memref<128x128xf32, #tpu.memory_space<vmem>>, vector<128x128xf32>,
    } else {
    }
    return
  }
  func.func @transform_0(%arg0: i32, %arg1: i32) -> (i32, i32) {
    %c0_i32 = arith.constant 0 : i32
    return %arg0, %arg1 : i32, i32
  }
  func.func @transform_1(%arg0: i32, %arg1: i32) -> (i32, i32) {
    %c0_i32 = arith.constant 0 : i32
    %c0_i32_0 = arith.constant 0 : i32
    return %arg1, %c0_i32 : i32, i32
  }
  func.func @transform_2(%arg0: i32, %arg1: i32) -> (i32, i32) {
    %c0_i32 = arith.constant 0 : i32
    %c0_i32_0 = arith.constant 0 : i32
    return %arg0, %c0_i32 : i32, i32
  }
  func.func @transform_3(%arg0: i32, %arg1: i32) -> (i32, i32) {
    %c0_i32 = arith.constant 0 : i32
    %c0_i32_0 = arith.constant 0 : i32
    %c0_i32_1 = arith.constant 0 : i32
    return %c0_i32, %c0_i32_0 : i32, i32
  }
  func.func @transform_4(%arg0: i32, %arg1: i32) -> (i32, i32) {
    %c0_i32 = arith.constant 0 : i32
    %c0_i32_0 = arith.constant 0 : i32
    return %arg0, %c0_i32 : i32, i32
  }
}

module attributes {stable_mosaic.version = 11 : i64} {
  func.func @_score_gate_kernel(%arg0: i32, %arg1: i32, %arg2: memref<128x128xbf16, #tpu.memory_space<vmem>>, %arg3: memref<1x128xf32, #tpu.memory_space<vmem>>, %arg4: memref<128x128xf32, #tpu.memory_space<vmem>>, %arg5: memref<128x1xf32, #tpu.memory_space<vmem>>, %arg6: memref<1x1xf32, #tpu.memory_space<vmem>>, %arg7: memref<128x128xf32, #tpu.memory_space<vmem>>, %arg8: memref<128x1xf32, #tpu.memory_space<vmem>>) attributes {dimension_semantics = [#tpu.dimension_semantics<parallel>, #tpu.dimension_semantics<arbitrary>], iteration_bounds = array<i64: 1, 1>, scalar_prefetch = 0 : i64, scratch_operands = 1 : i64, tpu.core_type = #tpu.core_type<tc>, window_params = [{transform_indices = @transform_0, window_bounds = array<i64: 128, 128>}, {transform_indices = @transform_1, window_bounds = array<i64: 1, 128>}, {transform_indices = @transform_2, window_bounds = array<i64: 128, 128>}, {transform_indices = @transform_3, window_bounds = array<i64: 128, 1>}, {pipeline_mode = #tpu.pipeline_mode<synchronous>, transform_indices = @transform_4, window_bounds = array<i64: 1, 1>}, {transform_indices = @transform_5, window_bounds = array<i64: 128, 128>}]} {
    %c0_i32 = arith.constant 0 : i32
    %0 = arith.cmpi eq, %arg1, %c0_i32 : i32
    %1 = arith.extui %0 : i1 to i32
    %c0_i32_0 = arith.constant 0 : i32
    %2 = arith.cmpi ne, %1, %c0_i32_0 : i32
    scf.if %2 {
      %cst_11 = arith.constant 0.000000e+00 : f32
      %28 = vector.broadcast %cst_11 : f32 to vector<128x1xf32>
      %c0_12 = arith.constant 0 : index
      %c0_13 = arith.constant 0 : index
      %29 = vector.load %arg8[%c0_12, %c0_13] : memref<128x1xf32, #tpu.memory_space<vmem>>, vector<128x1xf32>
      tpu.vector_store %arg8[%c0_12, %c0_13], %28 {strides = array<i32>} : memref<128x1xf32, #tpu.memory_space<vmem>>, vector<128x1xf32>,
    } else {
    }
    %c0 = arith.constant 0 : index
    %c0_1 = arith.constant 0 : index
    %3 = vector.load %arg2[%c0, %c0_1] : memref<128x128xbf16, #tpu.memory_space<vmem>>, vector<128x128xbf16>
    %4 = arith.extf %3 : vector<128x128xbf16> to vector<128x128xf32>
    %c128_i32 = arith.constant 128 : i32
    %5 = arith.muli %arg0, %c128_i32 : i32
    %6 = tpu.iota {dimensions = array<i32: 0>} : vector<128x128xi32>
    %7 = vector.broadcast %5 : i32 to vector<128x128xi32>
    %8 = arith.addi %7, %6 : vector<128x128xi32>
    %c128_i32_2 = arith.constant 128 : i32
    %9 = arith.muli %arg1, %c128_i32_2 : i32
    %10 = tpu.iota {dimensions = array<i32: 1>} : vector<128x128xi32>
    %11 = vector.broadcast %9 : i32 to vector<128x128xi32>
    %12 = arith.addi %11, %10 : vector<128x128xi32>
    %13 = arith.cmpi eq, %8, %12 : vector<128x128xi32>
    %14 = arith.extui %13 : vector<128x128xi1> to vector<128x128xi32>
    %15 = arith.sitofp %14 : vector<128x128xi32> to vector<128x128xf32>
    %16 = arith.addf %4, %15 : vector<128x128xf32>
    %c0_3 = arith.constant 0 : index
    %c0_4 = arith.constant 0 : index
    %17 = vector.load %arg8[%c0_3, %c0_4] : memref<128x1xf32, #tpu.memory_space<vmem>>, vector<128x1xf32>
    %c0_5 = arith.constant 0 : index
    %c0_6 = arith.constant 0 : index
    %18 = vector.load %arg3[%c0_5, %c0_6] : memref<1x128xf32, #tpu.memory_space<vmem>>, vector<1x128xf32>
    %19 = vector.broadcast %18 : vector<1x128xf32> to vector<128x128xf32>
    %20 = arith.mulf %16, %19 : vector<128x128xf32>
    %cst = arith.constant dense<0.000000e+00> : vector<128xf32>
    %21 = vector.multi_reduction <add>, %20, %cst [1] : vector<128x128xf32> to vector<128xf32>
    %22 = vector.shape_cast %21 : vector<128xf32> to vector<128x1xf32>
    %23 = arith.addf %17, %22 : vector<128x1xf32>
    %c0_7 = arith.constant 0 : index
    %c0_8 = arith.constant 0 : index
    %24 = vector.load %arg8[%c0_7, %c0_8] : memref<128x1xf32, #tpu.memory_space<vmem>>, vector<128x1xf32>
    tpu.vector_store %arg8[%c0_7, %c0_8], %23 {strides = array<i32>} : memref<128x1xf32, #tpu.memory_space<vmem>>, vector<128x1xf32>,
    %c0_i32_9 = arith.constant 0 : i32
    %25 = arith.cmpi eq, %arg1, %c0_i32_9 : i32
    %26 = arith.extui %25 : i1 to i32
    %c0_i32_10 = arith.constant 0 : i32
    %27 = arith.cmpi ne, %26, %c0_i32_10 : i32
    scf.if %27 {
      %c0_11 = arith.constant 0 : index
      %c0_12 = arith.constant 0 : index
      %28 = vector.load %arg8[%c0_11, %c0_12] : memref<128x1xf32, #tpu.memory_space<vmem>>, vector<128x1xf32>
      %c0_13 = arith.constant 0 : index
      %c0_14 = arith.constant 0 : index
      %29 = vector.load %arg5[%c0_13, %c0_14] : memref<128x1xf32, #tpu.memory_space<vmem>>, vector<128x1xf32>
      %30 = arith.mulf %28, %29 : vector<128x1xf32>
      %c0_15 = arith.constant 0 : index
      %c0_16 = arith.constant 0 : index
      %31 = vector.load %arg6[%c0_15, %c0_16] : memref<1x1xf32, #tpu.memory_space<vmem>>, vector<1x1xf32>
      %32 = vector.broadcast %31 : vector<1x1xf32> to vector<128x1xf32>
      %33 = arith.addf %30, %32 : vector<128x1xf32>
      %c0_17 = arith.constant 0 : index
      %c0_18 = arith.constant 0 : index
      %34 = vector.load %arg4[%c0_17, %c0_18] : memref<128x128xf32, #tpu.memory_space<vmem>>, vector<128x128xf32>
      %35 = math.tanh %33 : vector<128x1xf32>
      %36 = vector.broadcast %35 : vector<128x1xf32> to vector<128x128xf32>
      %37 = arith.mulf %34, %36 : vector<128x128xf32>
      %38 = tpu.iota {dimensions = array<i32: 1>} : vector<128x128xi32>
      %c32_i32 = arith.constant 32 : i32
      %39 = vector.broadcast %c32_i32 : i32 to vector<128x128xi32>
      %40 = arith.cmpi eq, %38, %39 : vector<128x128xi32>
      %41 = vector.shape_cast %33 : vector<128x1xf32> to vector<128x1xf32>
      %42 = vector.broadcast %41 : vector<128x1xf32> to vector<128x128xf32>
      %43 = arith.select %40, %42, %37 : vector<128x128xi1>, vector<128x128xf32>
      %c0_19 = arith.constant 0 : index
      %c0_20 = arith.constant 0 : index
      %44 = vector.load %arg7[%c0_19, %c0_20] : memref<128x128xf32, #tpu.memory_space<vmem>>, vector<128x128xf32>
      tpu.vector_store %arg7[%c0_19, %c0_20], %43 {strides = array<i32>} : memref<128x128xf32, #tpu.memory_space<vmem>>, vector<128x128xf32>,
    } else {
    }
    return
  }
  func.func @transform_0(%arg0: i32, %arg1: i32) -> (i32, i32) {
    %c0_i32 = arith.constant 0 : i32
    return %arg0, %arg1 : i32, i32
  }
  func.func @transform_1(%arg0: i32, %arg1: i32) -> (i32, i32) {
    %c0_i32 = arith.constant 0 : i32
    %c0_i32_0 = arith.constant 0 : i32
    return %c0_i32, %arg1 : i32, i32
  }
  func.func @transform_2(%arg0: i32, %arg1: i32) -> (i32, i32) {
    %c0_i32 = arith.constant 0 : i32
    %c0_i32_0 = arith.constant 0 : i32
    return %arg0, %c0_i32 : i32, i32
  }
  func.func @transform_3(%arg0: i32, %arg1: i32) -> (i32, i32) {
    %c0_i32 = arith.constant 0 : i32
    %c0_i32_0 = arith.constant 0 : i32
    return %arg0, %c0_i32 : i32, i32
  }
  func.func @transform_4(%arg0: i32, %arg1: i32) -> (i32, i32) {
    %c0_i32 = arith.constant 0 : i32
    %c0_i32_0 = arith.constant 0 : i32
    %c0_i32_1 = arith.constant 0 : i32
    return %c0_i32, %c0_i32_0 : i32, i32
  }
  func.func @transform_5(%arg0: i32, %arg1: i32) -> (i32, i32) {
    %c0_i32 = arith.constant 0 : i32
    %c0_i32_0 = arith.constant 0 : i32
    return %arg0, %c0_i32 : i32, i32
  }
}

module attributes {stable_mosaic.version = 11 : i64} {
  func.func @_readout_kernel(%arg0: i32, %arg1: memref<128x128xf32, #tpu.memory_space<vmem>>, %arg2: memref<8x128xf32, #tpu.memory_space<vmem>>, %arg3: memref<8x1xf32, #tpu.memory_space<vmem>>, %arg4: memref<8x256xf32, #tpu.memory_space<vmem>>, %arg5: memref<8x128xf32, #tpu.memory_space<vmem>>, %arg6: memref<8x128xf32, #tpu.memory_space<vmem>>) attributes {dimension_semantics = [#tpu.dimension_semantics<arbitrary>], iteration_bounds = array<i64: 1>, scalar_prefetch = 0 : i64, scratch_operands = 2 : i64, tpu.core_type = #tpu.core_type<tc>, window_params = [{transform_indices = @transform_0, window_bounds = array<i64: 128, 128>}, {transform_indices = @transform_1, window_bounds = array<i64: 8, 128>}, {pipeline_mode = #tpu.pipeline_mode<synchronous>, transform_indices = @transform_2, window_bounds = array<i64: 8, 1>}, {pipeline_mode = #tpu.pipeline_mode<synchronous>, transform_indices = @transform_3, window_bounds = array<i64: 8, 256>}]} {
    %c0_i32 = arith.constant 0 : i32
    %0 = arith.cmpi eq, %arg0, %c0_i32 : i32
    %1 = arith.extui %0 : i1 to i32
    %c0_i32_0 = arith.constant 0 : i32
    %2 = arith.cmpi ne, %1, %c0_i32_0 : i32
    scf.if %2 {
      %cst_17 = arith.constant 0xFF800000 : f32
      %26 = vector.broadcast %cst_17 : f32 to vector<8x128xf32>
      %c0_18 = arith.constant 0 : index
      %c0_19 = arith.constant 0 : index
      %27 = vector.load %arg5[%c0_18, %c0_19] : memref<8x128xf32, #tpu.memory_space<vmem>>, vector<8x128xf32>
      tpu.vector_store %arg5[%c0_18, %c0_19], %26 {strides = array<i32>} : memref<8x128xf32, #tpu.memory_space<vmem>>, vector<8x128xf32>,
      %cst_20 = arith.constant 0.000000e+00 : f32
      %28 = vector.broadcast %cst_20 : f32 to vector<8x128xf32>
      %c0_21 = arith.constant 0 : index
      %c0_22 = arith.constant 0 : index
      %29 = vector.load %arg6[%c0_21, %c0_22] : memref<8x128xf32, #tpu.memory_space<vmem>>, vector<8x128xf32>
      tpu.vector_store %arg6[%c0_21, %c0_22], %28 {strides = array<i32>} : memref<8x128xf32, #tpu.memory_space<vmem>>, vector<8x128xf32>,
    } else {
    }
    %c0 = arith.constant 0 : index
    %c0_1 = arith.constant 0 : index
    %3 = vector.load %arg1[%c0, %c0_1] : memref<128x128xf32, #tpu.memory_space<vmem>>, vector<128x128xf32>
    %c0_2 = arith.constant 0 : index
    %c0_3 = arith.constant 0 : index
    %4 = vector.load %arg2[%c0_2, %c0_3] : memref<8x128xf32, #tpu.memory_space<vmem>>, vector<8x128xf32>
    %c0_4 = arith.constant 0 : index
    %c0_5 = arith.constant 0 : index
    %5 = vector.load %arg6[%c0_4, %c0_5] : memref<8x128xf32, #tpu.memory_space<vmem>>, vector<8x128xf32>
    %cst = arith.constant dense<0.000000e+00> : vector<8x128xf32>
    %6 = tpu.matmul %4, %3, %cst {dimension_numbers = #tpu.dot_dimension_numbers<[1], [0], [0], [1], [0, 0, 1, 1], [], []>} : vector<8x128xf32>, vector<128x128xf32>, vector<8x128xf32> -> vector<8x128xf32>
    %7 = arith.addf %5, %6 : vector<8x128xf32>
    %c0_6 = arith.constant 0 : index
    %c0_7 = arith.constant 0 : index
    %8 = vector.load %arg6[%c0_6, %c0_7] : memref<8x128xf32, #tpu.memory_space<vmem>>, vector<8x128xf32>
    tpu.vector_store %arg6[%c0_6, %c0_7], %7 {strides = array<i32>} : memref<8x128xf32, #tpu.memory_space<vmem>>, vector<8x128xf32>,
    %9 = vector.shape_cast %4 : vector<8x128xf32> to vector<8x128x1xf32>
    %cst_8 = arith.constant 0.000000e+00 : f32
    %10 = vector.broadcast %cst_8 : f32 to vector<8x128x1xf32>
    %11 = arith.cmpf ogt, %9, %10 : vector<8x128x1xf32>
    %12 = vector.shape_cast %3 : vector<128x128xf32> to vector<1x128x128xf32>
    %cst_9 = arith.constant 0xFF800000 : f32
    %13 = vector.shape_cast %11 : vector<8x128x1xi1> to vector<8x128x1xi1>
    %14 = vector.broadcast %13 : vector<8x128x1xi1> to vector<8x128x128xi1>
    %15 = vector.shape_cast %12 : vector<1x128x128xf32> to vector<1x128x128xf32>
    %16 = vector.broadcast %15 : vector<1x128x128xf32> to vector<8x128x128xf32>
    %17 = vector.broadcast %cst_9 : f32 to vector<8x128x128xf32>
    %18 = arith.select %14, %16, %17 : vector<8x128x128xi1>, vector<8x128x128xf32>
    %c0_10 = arith.constant 0 : index
    %c0_11 = arith.constant 0 : index
    %19 = vector.load %arg5[%c0_10, %c0_11] : memref<8x128xf32, #tpu.memory_space<vmem>>, vector<8x128xf32>
    %cst_12 = arith.constant dense<0xFF800000> : vector<8x128xf32>
    %20 = vector.multi_reduction <maximumf>, %18, %cst_12 [1] : vector<8x128x128xf32> to vector<8x128xf32>
    %21 = arith.maximumf %19, %20 : vector<8x128xf32>
    %c0_13 = arith.constant 0 : index
    %c0_14 = arith.constant 0 : index
    %22 = vector.load %arg5[%c0_13, %c0_14] : memref<8x128xf32, #tpu.memory_space<vmem>>, vector<8x128xf32>
    tpu.vector_store %arg5[%c0_13, %c0_14], %21 {strides = array<i32>} : memref<8x128xf32, #tpu.memory_space<vmem>>, vector<8x128xf32>,
    %c0_i32_15 = arith.constant 0 : i32
    %23 = arith.cmpi eq, %arg0, %c0_i32_15 : i32
    %24 = arith.extui %23 : i1 to i32
    %c0_i32_16 = arith.constant 0 : i32
    %25 = arith.cmpi ne, %24, %c0_i32_16 : i32
    scf.if %25 {
      %c0_17 = arith.constant 0 : index
      %c0_18 = arith.constant 0 : index
      %26 = vector.load %arg6[%c0_17, %c0_18] : memref<8x128xf32, #tpu.memory_space<vmem>>, vector<8x128xf32>
      %c0_19 = arith.constant 0 : index
      %c0_20 = arith.constant 0 : index
      %27 = vector.load %arg3[%c0_19, %c0_20] : memref<8x1xf32, #tpu.memory_space<vmem>>, vector<8x1xf32>
      %28 = tpu.reciprocal %27 {approx = true} : vector<8x1xf32> -> vector<8x1xf32>
      %29 = vector.broadcast %28 : vector<8x1xf32> to vector<8x128xf32>
      %30 = arith.mulf %26, %29 : vector<8x128xf32>
      %c0_21 = arith.constant 0 : index
      %c0_22 = arith.constant 0 : index
      %31 = vector.load %arg5[%c0_21, %c0_22] : memref<8x128xf32, #tpu.memory_space<vmem>>, vector<8x128xf32>
      %32 = tpu.concatenate %31, %30 in 1 : vector<8x128xf32>, vector<8x128xf32> -> vector<8x256xf32>
      %c0_23 = arith.constant 0 : index
      %c0_24 = arith.constant 0 : index
      %33 = vector.load %arg4[%c0_23, %c0_24] : memref<8x256xf32, #tpu.memory_space<vmem>>, vector<8x256xf32>
      tpu.vector_store %arg4[%c0_23, %c0_24], %32 {strides = array<i32>} : memref<8x256xf32, #tpu.memory_space<vmem>>, vector<8x256xf32>,
    } else {
    }
    return
  }
  func.func @transform_0(%arg0: i32) -> (i32, i32) {
    %c0_i32 = arith.constant 0 : i32
    %c0_i32_0 = arith.constant 0 : i32
    return %arg0, %c0_i32 : i32, i32
  }
  func.func @transform_1(%arg0: i32) -> (i32, i32) {
    %c0_i32 = arith.constant 0 : i32
    %c0_i32_0 = arith.constant 0 : i32
    return %c0_i32, %arg0 : i32, i32
  }
  func.func @transform_2(%arg0: i32) -> (i32, i32) {
    %c0_i32 = arith.constant 0 : i32
    %c0_i32_0 = arith.constant 0 : i32
    %c0_i32_1 = arith.constant 0 : i32
    return %c0_i32, %c0_i32_0 : i32, i32
  }
  func.func @transform_3(%arg0: i32) -> (i32, i32) {
    %c0_i32 = arith.constant 0 : i32
    %c0_i32_0 = arith.constant 0 : i32
    %c0_i32_1 = arith.constant 0 : i32
    return %c0_i32, %c0_i32_0 : i32, i32
  }
}

</mosaic_0001>

<bundles_post_ra>
// kernel: graph_encoder_forward.10
= control target key start
LH: loop header
LB: loop body
LE: loop exit
PB: predicated region body
PF: predicated region fallthrough
CT: control target
= control target key end

     0   :  { %v76_v0 = vlaneseq  ;;  %v690_v14 = vmov 0.0   ;;  %vm26_vm12 = vcmask 7168   ;;  %s1110_s0 = inlined_call_operand.vmem [shape: bf16[128,128], index: 0, kind: input, shape index: {}]   ;;  %s1111_s1 = inlined_call_operand.vmem [shape: f32[1,128], index: 1, kind: input, shape index: {}]   ;;  %s1112_s4 = inlined_call_operand.<no memory space> [shape: f32[1,1], index: 4, kind: input, shape index: {}]   ;;  %s1113_s3 = inlined_call_operand.vmem [shape: f32[128,1], index: 3, kind: input, shape index: {}]   ;;  %s1114_s2 = inlined_call_operand.vmem [shape: f32[128,128], index: 2, kind: input, shape index: {}]   ;;  %s1115_s5 = inlined_call_operand.vmem [shape: f32[128,128], index: 5, kind: output, shape index: {}]  }
   0x1   :  { %v613_v1 = vld [vmem:[%s1110_s0] sm:$0xff]   ;;  %v645_v5 = vld [vmem:[%s1110_s0 + $0x10] sm:$0xff]   ;;  %v644_v6 = vld [vmem:[%s1110_s0 + $0x8] sm:$0xff]   ;;  %27 = vst.msk [vmem:[#allocation2] sm:$0xff] %vm26_vm12, %v690_v14 }
   0x2   :  { %v614_v2 = vunpack.c.l.bf16 %v613_v1  ;;  %v725_v3 = vshrl.u32 %v76_v0, 7  ;;  %v727_v4 = vand.u32 127, %v76_v0  ;;  %v622_v7 = vunpack.c.l.bf16 %v645_v5  ;;  %v740_v10 = vld [vmem:[%s1111_s1] ss:$0 sm:$0xff]  ;;  %v646_v34 = vld [vmem:[%s1110_s0 + $0x18] sm:$0xff]   ;;  %v648_v54 = vld [vmem:[%s1110_s0 + $0x28] sm:$0xff]  }
   0x3   :  { %v618_v8 = vunpack.c.l.bf16 %v644_v6  ;;  %v615_v9 = vunpack.c.h.bf16 %v613_v1  ;;  %v623_v16 = vunpack.c.h.bf16 %v645_v5  ;;  %v619_v26 = vunpack.c.h.bf16 %v644_v6  ;;  %v647_v37 = vld [vmem:[%s1110_s0 + $0x20] sm:$0xff]   ;;  %28 = vst.msk [vmem:[#allocation2 + $0x8] sm:$0xff] %vm26_vm12, %v690_v14 }
   0x4   :  { %vm115_vm0 = vcmp.eq.s32.totalorder %v725_v3, %v727_v4  ;;  %v81_v11 = vadd.s32 32, %v725_v3  ;;  %v79_v12 = vadd.s32 16, %v725_v3  ;;  %v78_v13 = vadd.s32 8, %v725_v3  ;;  %29 = vst.msk [vmem:[#allocation2 + $0x10] sm:$0xff] %vm26_vm12, %v690_v14 }
   0x5   :  { %v596_v15 = vsel %vm115_vm0, 1.0, %v690_v14  ;;  %v82_v17 = vadd.s32 40, %v725_v3  ;;  %v80_v18 = vadd.s32 24, %v725_v3  ;;  %v85_v28 = vadd.s32 64, %v725_v3  ;;  %30 = vst.msk [vmem:[#allocation2 + $0x18] sm:$0xff] %vm26_vm12, %v690_v14 }
   0x6   :  { %v163_v19 = vadd.f32 %v614_v2, %v596_v15  ;;  %vm119_vm1 = vcmp.eq.s32.totalorder %v81_v11, %v727_v4  ;;  %vm117_vm2 = vcmp.eq.s32.totalorder %v79_v12, %v727_v4  ;;  %vm116_vm3 = vcmp.eq.s32.totalorder %v78_v13, %v727_v4  ;;  %31 = vst.msk [vmem:[#allocation2 + $0x20] sm:$0xff] %vm26_vm12, %v690_v14  ;;  %v650_v15 = vld [vmem:[%s1110_s0 + $0x38] sm:$0xff]  }
   0x7   :  { %v600_v20 = vsel %vm119_vm1, 1.0, %v690_v14  ;;  %v598_v21 = vsel %vm117_vm2, 1.0, %v690_v14  ;;  %v597_v22 = vsel %vm116_vm3, 1.0, %v690_v14  ;;  %vm120_vm4 = vcmp.eq.s32.totalorder %v82_v17, %v727_v4  ;;  %32 = vst.msk [vmem:[#allocation2 + $0x28] sm:$0xff] %vm26_vm12, %v690_v14 }
   0x8   :  { %v199_v23 = vmul.f32 %v740_v10, %v163_v19  ;;  %v167_v24 = vadd.f32 %v622_v7, %v600_v20  ;;  %v165_v25 = vadd.f32 %v618_v8, %v598_v21  ;;  %v601_v27 = vsel %vm120_vm4, 1.0, %v690_v14  ;;  %v649_v7 = vld [vmem:[%s1110_s0 + $0x30] sm:$0xff]   ;;  %33 = vst.msk [vmem:[#allocation2 + $0x30] sm:$0xff] %vm26_vm12, %v690_v14 }
   0x9   :  { %vm118_vm5 = vcmp.eq.s32.totalorder %v80_v18, %v727_v4  ;;  %v164_v31 = vadd.f32 %v615_v9, %v597_v22  ;;  %v168_v32 = vadd.f32 %v623_v16, %v601_v27  ;;  %v83_v35 = vadd.s32 48, %v725_v3  ;;  %34 = vst.msk [vmem:[#allocation2 + $0x38] sm:$0xff] %vm26_vm12, %v690_v14 }
   0xa   :  { %215 = vadd.xlane.f32.xlu0 %v199_v23  ;;  %v203_v29 = vmul.f32 %v740_v10, %v167_v24  ;;  %v201_v30 = vmul.f32 %v740_v10, %v165_v25  ;;  %v599_v33 = vsel %vm118_vm5, 1.0, %v690_v14  ;;  %v84_v38 = vadd.s32 56, %v725_v3  ;;  %35 = vst.msk [vmem:[#allocation2 + $0x40] sm:$0xff] %vm26_vm12, %v690_v14 }
   0xb   :  { %v166_v36 = vadd.f32 %v619_v26, %v599_v33  ;;  %vm123_vm6 = vcmp.eq.s32.totalorder %v85_v28, %v727_v4  ;;  %vm121_vm7 = vcmp.eq.s32.totalorder %v83_v35, %v727_v4  ;;  %v200_v39 = vmul.f32 %v740_v10, %v164_v31  ;;  %36 = vst.msk [vmem:[#allocation2 + $0x48] sm:$0xff] %vm26_vm12, %v690_v14  ;;  %v179_v33 = vld [vmem:[#allocation2] sm:$0xff] }
   0xc   :  { %223 = vadd.xlane.f32.xlu2 %v203_v29  ;;  %219 = vadd.xlane.f32.xlu1 %v201_v30  ;;  %v626_v40 = vunpack.c.l.bf16 %v646_v34  ;;  %vm122_vm8 = vcmp.eq.s32.totalorder %v84_v38, %v727_v4  ;;  %v204_v41 = vmul.f32 %v740_v10, %v168_v32  ;;  %v630_v42 = vunpack.c.l.bf16 %v647_v37  ;;  %37 = vst.msk [vmem:[#allocation2 + $0x50] sm:$0xff] %vm26_vm12, %v690_v14 }
   0xd   :  { %v602_v43 = vsel %vm121_vm7, 1.0, %v690_v14  ;;  %v627_v44 = vunpack.c.h.bf16 %v646_v34  ;;  %v202_v45 = vmul.f32 %v740_v10, %v166_v36  ;;  %v604_v46 = vsel %vm123_vm6, 1.0, %v690_v14  ;;  %38 = vst.msk [vmem:[#allocation2 + $0x58] sm:$0xff] %vm26_vm12, %v690_v14  ;;  %v183_v35 = vld [vmem:[#allocation2 + $0x20] sm:$0xff] }
   0xe   :  { %v88_v47 = vadd.s32 88, %v725_v3  ;;  %v86_v48 = vadd.s32 72, %v725_v3  ;;  %v603_v49 = vsel %vm122_vm8, 1.0, %v690_v14  ;;  %v169_v50 = vadd.f32 %v626_v40, %v602_v43  ;;  %39 = vst.msk [vmem:[#allocation2 + $0x60] sm:$0xff] %vm26_vm12, %v690_v14  ;;  %v180_v40 = vld [vmem:[#allocation2 + $0x8] sm:$0xff]  ;;  %v182_v43 = vld [vmem:[#allocation2 + $0x18] sm:$0xff] }
   0xf   :  { %v87_v51 = vadd.s32 80, %v725_v3  ;;  %v171_v52 = vadd.f32 %v630_v42, %v604_v46  ;;  %v170_v53 = vadd.f32 %v627_v44, %v603_v49  ;;  %v631_v56 = vunpack.c.h.bf16 %v647_v37  ;;  %40 = vst.msk [vmem:[#allocation2 + $0x68] sm:$0xff] %vm26_vm12, %v690_v14  ;;  %v184_v42 = vld [vmem:[#allocation2 + $0x28] sm:$0xff]  ;;  %v299_v44 = vld [vmem:[%s1113_s3] sm:$0xff] }
  0x10   :  { %vm126_vm9 = vcmp.eq.s32.totalorder %v88_v47, %v727_v4  ;;  %vm124_vm10 = vcmp.eq.s32.totalorder %v86_v48, %v727_v4  ;;  %v205_v55 = vmul.f32 %v740_v10, %v169_v50  ;;  %v635_v58 = vunpack.c.h.bf16 %v648_v54  ;;  %41 = vst.msk [vmem:[#allocation2 + $0x70] sm:$0xff] %vm26_vm12, %v690_v14 }
  0x11   :  { %vm125_vm11 = vcmp.eq.s32.totalorder %v87_v51, %v727_v4  ;;  %v207_v57 = vmul.f32 %v740_v10, %v171_v52  ;;  %v607_v59 = vsel %vm126_vm9, 1.0, %v690_v14  ;;  %v605_v60 = vsel %vm124_vm10, 1.0, %v690_v14  ;;  %42 = vst.msk [vmem:[#allocation2 + $0x78] sm:$0xff] %vm26_vm12, %v690_v14 }
  0x12   :  { %217 = vadd.xlane.f32.xlu0 %v200_v39  ;;  %v206_v61 = vmul.f32 %v740_v10, %v170_v53  ;;  %v634_v62 = vunpack.c.l.bf16 %v648_v54  ;;  %v89_v63 = vadd.s32 96, %v725_v3  ;;  %v606_v0 = vsel %vm125_vm11, 1.0, %v690_v14  ;;  %v301_v53 = vld [vmem:[%s1113_s3 + $0x10] sm:$0xff] }
  0x13   :  { %v172_v1 = vadd.f32 %v631_v56, %v605_v60  ;;  %v91_v2 = vadd.s32 112, %v725_v3  ;;  %v90_v5 = vadd.s32 104, %v725_v3  ;;  %v174_v6 = vadd.f32 %v635_v58, %v607_v59  ;;  %v187_v59 = vld [vmem:[#allocation2 + $0x40] sm:$0xff] }
  0x14   :  { %225 = vadd.xlane.f32.xlu2 %v204_v41  ;;  %221 = vadd.xlane.f32.xlu1 %v202_v45  ;;  %v173_v8 = vadd.f32 %v634_v62, %v606_v0  ;;  %vm127_vm13 = vcmp.eq.s32.totalorder %v89_v63, %v727_v4  ;;  %v638_v11 = vunpack.c.l.bf16 %v649_v7  ;;  %v92_v17 = vadd.s32 120, %v725_v3  ;;  %v186_v62 = vld [vmem:[#allocation2 + $0x38] sm:$0xff] }
  0x15   :  { %v208_v9 = vmul.f32 %v740_v10, %v172_v1  ;;  %vm129_vm14 = vcmp.eq.s32.totalorder %v91_v2, %v727_v4  ;;  %vm128_vm15 = vcmp.eq.s32.totalorder %v90_v5, %v727_v4  ;;  %v210_v12 = vmul.f32 %v740_v10, %v174_v6  ;;  %v304_v5 = vld [vmem:[%s1113_s3 + $0x28] sm:$0xff] }
  0x16   :  { %v608_v13 = vsel %vm127_vm13, 1.0, %v690_v14  ;;  %v209_v16 = vmul.f32 %v740_v10, %v173_v8  ;;  %v642_v18 = vunpack.c.l.bf16 %v650_v15  ;;  %v639_v19 = vunpack.c.h.bf16 %v649_v7 }
  0x17   :  { %v610_v20 = vsel %vm129_vm14, 1.0, %v690_v14  ;;  %v609_v21 = vsel %vm128_vm15, 1.0, %v690_v14  ;;  %v175_v22 = vadd.f32 %v638_v11, %v608_v13  ;;  %vm130_vm0 = vcmp.eq.s32.totalorder %v92_v17, %v727_v4  ;;  %v303_v13 = vld [vmem:[%s1113_s3 + $0x20] sm:$0xff] }
  0x18   :  { %v177_v3 = vadd.f32 %v642_v18, %v610_v20  ;;  %v176_v23 = vadd.f32 %v639_v19, %v609_v21  ;;  %v643_v25 = vunpack.c.h.bf16 %v650_v15  ;;  %v611_v26 = vsel %vm130_vm0, 1.0, %v690_v14  ;;  %v181_v14 = vld [vmem:[#allocation2 + $0x10] sm:$0xff]  ;;  %v188_v19 = vld [vmem:[#allocation2 + $0x48] sm:$0xff] }
  0x19   :  { %v211_v24 = vmul.f32 %v740_v10, %v175_v22  ;;  %v10_v31 = vstv %s1112_s4  ;;  %v691_v32 = vmov 0   ;;  %vm479_vm1 = vcmp.eq.s32.totalorder %v727_v4, 32 }
  0x1a   :  { %227 = vadd.xlane.f32.xlu0 %v205_v55  ;;  %v213_v27 = vmul.f32 %v740_v10, %v177_v3  ;;  %v212_v28 = vmul.f32 %v740_v10, %v176_v23  ;;  %v178_v29 = vadd.f32 %v643_v25, %v611_v26  ;;  %11 = vst [vmem:[#allocation3] sm:$0x1] %v10_v31  ;;  %v190_v3 = vld [vmem:[#allocation2 + $0x58] sm:$0xff]  ;;  %v305_v25 = vld [vmem:[%s1113_s3 + $0x30] sm:$0xff] }
  0x1b   :  { %653 = vset.pattern.permute.xlu2 %v691_v32  ;;  %655 = vset.pattern.permute.xlu0 %v691_v32 }
  0x1c   :  { %231 = vadd.xlane.f32.xlu2 %v207_v57  ;;  %229 = vadd.xlane.f32.xlu1 %v206_v61  ;;  %v214_v30 = vmul.f32 %v740_v10, %v178_v29  ;;  %v185_v57 = vld [vmem:[#allocation2 + $0x30] sm:$0xff]  ;;  %v300_v61 = vld [vmem:[%s1113_s3 + $0x8] sm:$0xff]  ;;  %v307_v29 = vld [vmem:[%s1113_s3 + $0x40] sm:$0xff] }
  0x1d   :  { %654 = vset.pattern.permute.xlu1 %v691_v32 }
  0x21   :  { %v860_v46 = vld [vmem:[#allocation3] ss:$0 sm:$0xff] }
  0x22   :  { %233 = vadd.xlane.f32.xlu0 %v208_v9  ;;  %v302_v9 = vld [vmem:[%s1113_s3 + $0x18] sm:$0xff] }
  0x24   :  { %237 = vadd.xlane.f32.xlu2 %v210_v12  ;;  %235 = vadd.xlane.f32.xlu1 %v209_v16 }
  0x2a   :  { %239 = vadd.xlane.f32.xlu0 %v211_v24  ;;  %v189_v24 = vld [vmem:[#allocation2 + $0x50] sm:$0xff] }
  0x2c   :  { %243 = vadd.xlane.f32.xlu2 %v213_v27  ;;  %241 = vadd.xlane.f32.xlu1 %v212_v28 }
  0x32   :  { %245 = vadd.xlane.f32.xlu0 %v214_v30 }
  0x7d   :  { %v216_v34 = vpop.xlane.xlu0 %215 }
  0x7e   :  { %v247_v36 = vadd.f32 %v216_v34, %v179_v33 }
  0x7f   :  { %v224_v37 = vpop.xlane.xlu2 %223  ;;  %v220_v38 = vpop.xlane.xlu1 %219 }
  0x80   :  { %264 = vst.msk [vmem:[#allocation2] sm:$0xff] %vm26_vm12, %v247_v36  ;;  %v251_v10 = vadd.f32 %v224_v37, %v183_v35  ;;  %v249_v39 = vadd.f32 %v220_v38, %v181_v14  ;;  %v306_v14 = vld [vmem:[%s1113_s3 + $0x38] sm:$0xff] }
  0x82   :  { %268 = vst.msk [vmem:[#allocation2 + $0x20] sm:$0xff] %vm26_vm12, %v251_v10  ;;  %v191_v10 = vld [vmem:[#allocation2 + $0x60] sm:$0xff] }
  0x83   :  { %266 = vst.msk [vmem:[#allocation2 + $0x10] sm:$0xff] %vm26_vm12, %v249_v39 }
  0x85   :  { %v218_v41 = vpop.xlane.xlu0 %217 }
  0x86   :  { %v248_v45 = vadd.f32 %v218_v41, %v180_v40 }
  0x87   :  { %v226_v47 = vpop.xlane.xlu2 %225  ;;  %v222_v48 = vpop.xlane.xlu1 %221  ;;  %v283_v49 = vld [vmem:[#allocation2] sm:$0xff] }
  0x88   :  { %265 = vst.msk [vmem:[#allocation2 + $0x8] sm:$0xff] %vm26_vm12, %v248_v45  ;;  %v252_v50 = vadd.f32 %v226_v47, %v184_v42  ;;  %v250_v51 = vadd.f32 %v222_v48, %v182_v43  ;;  %v315_v52 = vmul.f32 %v299_v44, %v283_v49  ;;  %v308_v42 = vld [vmem:[%s1113_s3 + $0x48] sm:$0xff]  ;;  %v310_v44 = vld [vmem:[%s1113_s3 + $0x58] sm:$0xff]  ;;  %v193_v47 = vld [vmem:[#allocation2 + $0x70] sm:$0xff] }
  0x89   :  { %v287_v12 = vld [vmem:[#allocation2 + $0x20] sm:$0xff] }
  0x8a   :  { %269 = vst.msk [vmem:[#allocation2 + $0x28] sm:$0xff] %vm26_vm12, %v252_v50  ;;  %v868_v54 = vadd.f32 %v860_v46, %v315_v52  ;;  %v285_v55 = vld [vmem:[#allocation2 + $0x10] sm:$0xff]  ;;  %v319_v21 = vmul.f32 %v303_v13, %v287_v12  ;;  %v314_v13 = vld [vmem:[%s1113_s3 + $0x78] sm:$0xff] }
  0x8b   :  { %267 = vst.msk [vmem:[#allocation2 + $0x18] sm:$0xff] %vm26_vm12, %v250_v51  ;;  %v317_v56 = vmul.f32 %v301_v53, %v285_v55  ;;  %v309_v53 = vld [vmem:[%s1113_s3 + $0x50] sm:$0xff] }
  0x8c   :  { %482 = vperm.xlu2 %653, %v868_v54   ;;  %v911_v32 = vadd.f32 %v860_v46, %v319_v21 }
  0x8d   :  { %v873_v58 = vadd.f32 %v860_v46, %v317_v56  ;;  %v228_v60 = vpop.xlane.xlu0 %227 }
  0x8e   :  { %v253_v63 = vadd.f32 %v228_v60, %v185_v57 }
  0x8f   :  { %492 = vperm.xlu0 %655, %v873_v58   ;;  %v232_v0 = vpop.xlane.xlu2 %231  ;;  %v284_v1 = vld [vmem:[#allocation2 + $0x8] sm:$0xff]  ;;  %v230_v2 = vpop.xlane.xlu1 %229  ;;  %658 = vtanh.f32 %v873_v58 }
  0x90   :  { %v255_v6 = vadd.f32 %v232_v0, %v187_v59  ;;  %270 = vst.msk [vmem:[#allocation2 + $0x30] sm:$0xff] %vm26_vm12, %v253_v63  ;;  %v316_v7 = vmul.f32 %v300_v61, %v284_v1  ;;  %v254_v8 = vadd.f32 %v230_v2, %v186_v62  ;;  %v194_v59 = vld [vmem:[#allocation2 + $0x78] sm:$0xff]  ;;  %v311_v62 = vld [vmem:[%s1113_s3 + $0x60] sm:$0xff]  ;;  %v192_v2 = vld [vmem:[#allocation2 + $0x68] sm:$0xff]  ;;  %660 = vtanh.f32 %v868_v54 }
  0x91   :  { %v288_v11 = vld [vmem:[#allocation2 + $0x28] sm:$0xff] }
  0x92   :  { %272 = vst.msk [vmem:[#allocation2 + $0x40] sm:$0xff] %vm26_vm12, %v255_v6  ;;  %v891_v15 = vadd.f32 %v860_v46, %v316_v7  ;;  %v320_v16 = vmul.f32 %v304_v5, %v288_v11  ;;  %v286_v17 = vld [vmem:[#allocation2 + $0x18] sm:$0xff] }
  0x93   :  { %271 = vst.msk [vmem:[#allocation2 + $0x38] sm:$0xff] %vm26_vm12, %v254_v8  ;;  %v318_v18 = vmul.f32 %v302_v9, %v286_v17 }
  0x94   :  { %487 = vperm.xlu1 %654, %v891_v15   ;;  %v896_v20 = vadd.f32 %v860_v46, %v320_v16 }
  0x95   :  { %v899_v22 = vadd.f32 %v860_v46, %v318_v18  ;;  %v234_v23 = vpop.xlane.xlu0 %233  ;;  %v659_v11 = vpop.eup %658 }
  0x96   :  { %v256_v26 = vadd.f32 %v234_v23, %v188_v19  ;;  %v661_v58 = vpop.eup %660 }
  0x97   :  { %507 = vperm.xlu0 %655, %v896_v20   ;;  %497 = vperm.xlu2 %653, %v899_v22   ;;  %v238_v27 = vpop.xlane.xlu2 %237  ;;  %v236_v28 = vpop.xlane.xlu1 %235  ;;  %v289_v30 = vld [vmem:[#allocation2 + $0x30] sm:$0xff] }
  0x98   :  { %v258_v31 = vadd.f32 %v238_v27, %v190_v3  ;;  %273 = vst.msk [vmem:[#allocation2 + $0x48] sm:$0xff] %vm26_vm12, %v256_v26  ;;  %v257_v33 = vadd.f32 %v236_v28, %v189_v24  ;;  %v321_v34 = vmul.f32 %v305_v25, %v289_v30 }
  0x99   :  { %v291_v35 = vld [vmem:[#allocation2 + $0x40] sm:$0xff] }
  0x9a   :  { %275 = vst.msk [vmem:[#allocation2 + $0x58] sm:$0xff] %vm26_vm12, %v258_v31  ;;  %v323_v36 = vmul.f32 %v307_v29, %v291_v35  ;;  %v290_v37 = vld [vmem:[#allocation2 + $0x38] sm:$0xff]  ;;  %v919_v38 = vadd.f32 %v860_v46, %v321_v34  ;;  %v312_v29 = vld [vmem:[%s1113_s3 + $0x68] sm:$0xff] }
  0x9b   :  { %274 = vst.msk [vmem:[#allocation2 + $0x50] sm:$0xff] %vm26_vm12, %v257_v33  ;;  %v322_v40 = vmul.f32 %v306_v14, %v290_v37 }
  0x9c   :  { %502 = vperm.xlu1 %654, %v911_v32   ;;  %v923_v39 = vadd.f32 %v860_v46, %v323_v36 }
  0x9d   :  { %v240_v41 = vpop.xlane.xlu0 %239  ;;  %v935_v49 = vadd.f32 %v860_v46, %v322_v40 }
  0x9e   :  { %v259_v43 = vadd.f32 %v240_v41, %v191_v10 }
  0x9f   :  { %522 = vperm.xlu0 %655, %v923_v39   ;;  %512 = vperm.xlu2 %653, %v919_v38   ;;  %v292_v45 = vld [vmem:[#allocation2 + $0x48] sm:$0xff]  ;;  %v244_v48 = vpop.xlane.xlu2 %243  ;;  %v242_v5 = vpop.xlane.xlu1 %241 }
  0xa0   :  { %276 = vst.msk [vmem:[#allocation2 + $0x60] sm:$0xff] %vm26_vm12, %v259_v43  ;;  %v324_v50 = vmul.f32 %v308_v42, %v292_v45  ;;  %v261_v51 = vadd.f32 %v244_v48, %v193_v47  ;;  %v260_v8 = vadd.f32 %v242_v5, %v192_v2  ;;  %v352_v43 = vld [vmem:[%s1114_s2 + $0x8] sm:$0xff]  ;;  %v351_v2 = vld [vmem:[%s1114_s2] sm:$0xff] }
  0xa1   :  { %v294_v52 = vld [vmem:[#allocation2 + $0x58] sm:$0xff] }
  0xa2   :  { %v326_v55 = vmul.f32 %v310_v44, %v294_v52  ;;  %v293_v56 = vld [vmem:[#allocation2 + $0x50] sm:$0xff]  ;;  %278 = vst.msk [vmem:[#allocation2 + $0x70] sm:$0xff] %vm26_vm12, %v261_v51  ;;  %v344_v57 = vadd.f32 %v860_v46, %v324_v50  ;;  %v354_v50 = vld [vmem:[%s1114_s2 + $0x18] sm:$0xff] }
  0xa3   :  { %v325_v61 = vmul.f32 %v309_v53, %v293_v56  ;;  %277 = vst.msk [vmem:[#allocation2 + $0x68] sm:$0xff] %vm26_vm12, %v260_v8  ;;  %v360_v8 = vld [vmem:[%s1114_s2 + $0x48] sm:$0xff] }
  0xa4   :  { %517 = vperm.xlu1 %654, %v935_v49   ;;  %v346_v60 = vadd.f32 %v860_v46, %v326_v55  ;;  %662 = vtanh.f32 %v344_v57 }
  0xa5   :  { %v246_v63 = vpop.xlane.xlu0 %245  ;;  %v345_v6 = vadd.f32 %v860_v46, %v325_v61  ;;  %664 = vtanh.f32 %v891_v15 }
  0xa6   :  { %v262_v0 = vadd.f32 %v246_v63, %v194_v59  ;;  %666 = vtanh.f32 %v911_v32  ;;  %v353_v59 = vld [vmem:[%s1114_s2 + $0x10] sm:$0xff] }
  0xa7   :  { %537 = vperm.xlu0 %655, %v346_v60   ;;  %527 = vperm.xlu2 %653, %v344_v57   ;;  %v295_v1 = vld [vmem:[#allocation2 + $0x60] sm:$0xff]  ;;  %v356_v57 = vld [vmem:[%s1114_s2 + $0x28] sm:$0xff] }
  0xa8   :  { %v327_v7 = vmul.f32 %v311_v62, %v295_v1  ;;  %279 = vst.msk [vmem:[#allocation2 + $0x78] sm:$0xff] %vm26_vm12, %v262_v0 }
  0xa9   :  { %v297_v24 = vld [vmem:[#allocation2 + $0x70] sm:$0xff] }
  0xaa   :  { %v347_v9 = vadd.f32 %v860_v46, %v327_v7  ;;  %v663_v16 = vpop.eup %662  ;;  %v358_v7 = vld [vmem:[%s1114_s2 + $0x38] sm:$0xff] }
  0xab   :  { %v665_v17 = vpop.eup %664 }
  0xac   :  { %532 = vperm.xlu1 %654, %v345_v6   ;;  %668 = vtanh.f32 %v347_v9  ;;  %v667_v15 = vpop.eup %666 }
  0xad   :  { %670 = vtanh.f32 %v899_v22  ;;  %v313_v22 = vld [vmem:[%s1113_s3 + $0x70] sm:$0xff] }
  0xae   :  { %672 = vtanh.f32 %v919_v38  ;;  %v329_v26 = vmul.f32 %v313_v22, %v297_v24 }
  0xaf   :  { %395 = vperm.xlu0 %655, %v659_v11   ;;  %542 = vperm.xlu2 %653, %v347_v9   ;;  %v298_v12 = vld [vmem:[#allocation2 + $0x78] sm:$0xff] }
  0xb0   :  { %v330_v18 = vmul.f32 %v314_v13, %v298_v12  ;;  %v349_v28 = vadd.f32 %v860_v46, %v329_v26 }
  0xb2   :  { %v350_v54 = vadd.f32 %v860_v46, %v330_v18  ;;  %v669_v19 = vpop.eup %668  ;;  %v355_v18 = vld [vmem:[%s1114_s2 + $0x20] sm:$0xff] }
  0xb3   :  { %v671_v21 = vpop.eup %670 }
  0xb4   :  { %385 = vperm.xlu1 %654, %v661_v58   ;;  %674 = vtanh.f32 %v350_v54  ;;  %v673_v3 = vpop.eup %672 }
  0xb5   :  { %676 = vtanh.f32 %v896_v20  ;;  %v296_v20 = vld [vmem:[#allocation2 + $0x68] sm:$0xff] }
  0xb6   :  { %678 = vtanh.f32 %v923_v39  ;;  %v328_v31 = vmul.f32 %v312_v29, %v296_v20 }
  0xb7   :  { %430 = vperm.xlu0 %655, %v663_v16   ;;  %390 = vperm.xlu2 %653, %v665_v17   ;;  %680 = vtanh.f32 %v935_v49 }
  0xb8   :  { %682 = vtanh.f32 %v346_v60  ;;  %v348_v32 = vadd.f32 %v860_v46, %v328_v31 }
  0xb9   :  { %684 = vtanh.f32 %v345_v6 }
  0xba   :  { %v675_v23 = vpop.eup %674  ;;  %686 = vtanh.f32 %v349_v28 }
  0xbb   :  { %v677_v25 = vpop.eup %676  ;;  %688 = vtanh.f32 %v348_v32 }
  0xbc   :  { %405 = vperm.xlu1 %654, %v667_v15   ;;  %v679_v27 = vpop.eup %678 }
  0xbd   :  { %v681_v30 = vpop.eup %680 }
  0xbe   :  { %v683_v33 = vpop.eup %682 }
  0xbf   :  { %400 = vperm.xlu2 %653, %v671_v21   ;;  %445 = vperm.xlu0 %655, %v669_v19   ;;  %v685_v34 = vpop.eup %684  ;;  %v361_v19 = vld [vmem:[%s1114_s2 + $0x50] sm:$0xff]  ;;  %v363_v21 = vld [vmem:[%s1114_s2 + $0x60] sm:$0xff] }
  0xc0   :  { %v687_v35 = vpop.eup %686 }
  0xc1   :  { %v689_v14 = vpop.eup %688 }
  0xc4   :  { %415 = vperm.xlu1 %654, %v673_v3  }
  0xc7   :  { %410 = vperm.xlu2 %653, %v677_v25   ;;  %460 = vperm.xlu0 %655, %v675_v23  }
  0xcc   :  { %425 = vperm.xlu1 %654, %v679_v27  }
  0xcf   :  { %420 = vperm.xlu2 %653, %v681_v30   ;;  %552 = vperm.xlu0 %655, %v349_v28   ;;  %v357_v28 = vld [vmem:[%s1114_s2 + $0x30] sm:$0xff] }
  0xd4   :  { %440 = vperm.xlu1 %654, %v683_v33   ;;  %v366_v33 = vld [vmem:[%s1114_s2 + $0x78] sm:$0xff] }
  0xd7   :  { %435 = vperm.xlu2 %653, %v685_v34  }
  0xdc   :  { %455 = vperm.xlu1 %654, %v687_v35  }
  0xdf   :  { %450 = vperm.xlu2 %653, %v689_v14  }
  0xe4   :  { %547 = vperm.xlu1 %654, %v348_v32   ;;  %v359_v32 = vld [vmem:[%s1114_s2 + $0x40] sm:$0xff] }
  0xe6   :  { %v483_v36 = vpop.permute.xlu2 %482 }
  0xe7   :  { %557 = vperm.xlu2 %653, %v350_v54  }
  0xf1   :  { %v498_v37 = vpop.permute.xlu2 %497 }
  0xf9   :  { %v972_v38 = vpop.permute.xlu2 %512 }
 0x101   :  { %v528_v10 = vpop.permute.xlu2 %527  ;;  %v493_v39 = vpop.permute.xlu0 %492 }
 0x106   :  { %v488_v40 = vpop.permute.xlu1 %487 }
 0x109   :  { %v543_v46 = vpop.permute.xlu2 %542  ;;  %v508_v41 = vpop.permute.xlu0 %507 }
 0x10e   :  { %v503_v42 = vpop.permute.xlu1 %502 }
 0x111   :  { %v391_v44 = vpop.permute.xlu2 %390  ;;  %v978_v45 = vpop.permute.xlu0 %522 }
 0x112   :  { %v464_v47 = vmul.f32 %v391_v44, %v352_v43 }
 0x114   :  { %v561_v48 = vsel %vm479_vm1, %v488_v40, %v464_v47 }
 0x115   :  { %577 = vst [vmem:[%s1115_s5 + $0x8] sm:$0xff] %v561_v48  ;;  %v364_v48 = vld [vmem:[%s1114_s2 + $0x68] sm:$0xff] }
 0x116   :  { %v518_v49 = vpop.permute.xlu1 %517 }
 0x119   :  { %v401_v51 = vpop.permute.xlu2 %400  ;;  %v988_v52 = vpop.permute.xlu0 %537 }
 0x11a   :  { %v466_v53 = vmul.f32 %v401_v51, %v354_v50 }
 0x11c   :  { %v563_v55 = vsel %vm479_vm1, %v498_v37, %v466_v53 }
 0x11d   :  { %579 = vst [vmem:[%s1115_s5 + $0x18] sm:$0xff] %v563_v55 }
 0x11e   :  { %v533_v56 = vpop.permute.xlu1 %532 }
 0x121   :  { %v411_v60 = vpop.permute.xlu2 %410  ;;  %v396_v61 = vpop.permute.xlu0 %395 }
 0x122   :  { %v468_v62 = vmul.f32 %v411_v60, %v356_v57  ;;  %v465_v63 = vmul.f32 %v396_v61, %v353_v59 }
 0x124   :  { %v565_v0 = vsel %vm479_vm1, %v508_v41, %v468_v62  ;;  %v562_v1 = vsel %vm479_vm1, %v493_v39, %v465_v63  ;;  %v362_v39 = vld [vmem:[%s1114_s2 + $0x58] sm:$0xff] }
 0x125   :  { %581 = vst [vmem:[%s1115_s5 + $0x28] sm:$0xff] %v565_v0 }
 0x126   :  { %578 = vst [vmem:[%s1115_s5 + $0x10] sm:$0xff] %v562_v1  ;;  %v386_v5 = vpop.permute.xlu1 %385 }
 0x127   :  { %v463_v6 = vmul.f32 %v386_v5, %v351_v2 }
 0x129   :  { %v560_v9 = vsel %vm479_vm1, %v483_v36, %v463_v6  ;;  %v421_v11 = vpop.permute.xlu2 %420  ;;  %v431_v58 = vpop.permute.xlu0 %430 }
 0x12a   :  { %576 = vst [vmem:[%s1115_s5] sm:$0xff] %v560_v9  ;;  %v470_v12 = vmul.f32 %v421_v11, %v358_v7  ;;  %v472_v13 = vmul.f32 %v431_v58, %v360_v8 }
 0x12c   :  { %v567_v16 = vsel %vm479_vm1, %v518_v49, %v470_v12  ;;  %v569_v17 = vsel %vm479_vm1, %v528_v10, %v472_v13 }
 0x12d   :  { %583 = vst [vmem:[%s1115_s5 + $0x38] sm:$0xff] %v567_v16 }
 0x12e   :  { %585 = vst [vmem:[%s1115_s5 + $0x48] sm:$0xff] %v569_v17  ;;  %v406_v54 = vpop.permute.xlu1 %405 }
 0x12f   :  { %v467_v15 = vmul.f32 %v406_v54, %v355_v18 }
 0x131   :  { %v564_v3 = vsel %vm479_vm1, %v503_v42, %v467_v15  ;;  %v436_v23 = vpop.permute.xlu2 %435  ;;  %v446_v24 = vpop.permute.xlu0 %445  ;;  %v365_v42 = vld [vmem:[%s1114_s2 + $0x70] sm:$0xff] }
 0x132   :  { %580 = vst [vmem:[%s1115_s5 + $0x20] sm:$0xff] %v564_v3  ;;  %v473_v22 = vmul.f32 %v436_v23, %v361_v19  ;;  %v475_v25 = vmul.f32 %v446_v24, %v363_v21 }
 0x134   :  { %v570_v26 = vsel %vm479_vm1, %v533_v56, %v473_v22  ;;  %v572_v27 = vsel %vm479_vm1, %v543_v46, %v475_v25 }
 0x135   :  { %586 = vst [vmem:[%s1115_s5 + $0x50] sm:$0xff] %v570_v26 }
 0x136   :  { %588 = vst [vmem:[%s1115_s5 + $0x60] sm:$0xff] %v572_v27  ;;  %v416_v20 = vpop.permute.xlu1 %415 }
 0x137   :  { %v469_v29 = vmul.f32 %v416_v20, %v357_v28 }
 0x139   :  { %v566_v30 = vsel %vm479_vm1, %v972_v38, %v469_v29  ;;  %v451_v31 = vpop.permute.xlu2 %450  ;;  %v461_v34 = vpop.permute.xlu0 %460 }
 0x13a   :  { %582 = vst [vmem:[%s1115_s5 + $0x30] sm:$0xff] %v566_v30  ;;  %v478_v36 = vmul.f32 %v461_v34, %v366_v33  ;;  %v476_v49 = vmul.f32 %v451_v31, %v364_v48 }
 0x13e   :  { %v426_v35 = vpop.permute.xlu1 %425 }
 0x13f   :  { %v471_v14 = vmul.f32 %v426_v35, %v359_v32 }
 0x141   :  { %v568_v37 = vsel %vm479_vm1, %v978_v45, %v471_v14  ;;  %v558_v38 = vpop.permute.xlu2 %557  ;;  %v553_v45 = vpop.permute.xlu0 %552 }
 0x142   :  { %584 = vst [vmem:[%s1115_s5 + $0x40] sm:$0xff] %v568_v37  ;;  %v575_v10 = vsel %vm479_vm1, %v558_v38, %v478_v36 }
 0x143   :  { %591 = vst [vmem:[%s1115_s5 + $0x78] sm:$0xff] %v575_v10 }
 0x146   :  { %v441_v40 = vpop.permute.xlu1 %440 }
 0x147   :  { %v474_v46 = vmul.f32 %v441_v40, %v362_v39 }
 0x149   :  { %v571_v41 = vsel %vm479_vm1, %v988_v52, %v474_v46 }
 0x14a   :  { %587 = vst [vmem:[%s1115_s5 + $0x58] sm:$0xff] %v571_v41 }
 0x14e   :  { %v456_v43 = vpop.permute.xlu1 %455 }
 0x14f   :  { %v477_v44 = vmul.f32 %v456_v43, %v365_v42 }
 0x151   :  { %v574_v47 = vsel %vm479_vm1, %v553_v45, %v477_v44 }
 0x152   :  { %590 = vst [vmem:[%s1115_s5 + $0x70] sm:$0xff] %v574_v47 }
 0x156   :  { %v548_v50 = vpop.permute.xlu1 %547 }
 0x157   :  { %v573_v51 = vsel %vm479_vm1, %v548_v50, %v476_v49 }
 0x158   :  { %589 = vst [vmem:[%s1115_s5 + $0x68] sm:$0xff] %v573_v51 }

// kernel: graph_encoder_forward.9
= control target key start
LH: loop header
LB: loop body
LE: loop exit
PB: predicated region body
PF: predicated region fallthrough
CT: control target
= control target key end

     0   :  { %v598_v0 = vmov 0   ;;  %v70_v13 = vlaneseq  ;;  %v599_v35 = vmov 0.0   ;;  %s900_s2 = inlined_call_operand.vmem [shape: f32[128,1], index: 2, kind: input, shape index: {}]   ;;  %s901_s1 = inlined_call_operand.vmem [shape: f32[128,128], index: 1, kind: input, shape index: {}]   ;;  %s902_s0 = inlined_call_operand.vmem [shape: bf16[128,128], index: 0, kind: input, shape index: {}]   ;;  %s903_s3 = inlined_call_operand.vmem [shape: f32[1,128], index: 3, kind: input, shape index: {}]   ;;  %s904_s4 = inlined_call_operand.vmem [shape: f32[128,128], index: 4, kind: output, shape index: {}]  }
   0x1   :  { %594 = vset.pattern.permute.xlu0 %v598_v0  ;;  %v321_v1 = vld [vmem:[%s900_s2] sm:$0xff]  ;;  %v204_v2 = vld [vmem:[%s901_s1 + $0x78] sm:$0xff]  ;;  %v203_v3 = vld [vmem:[%s901_s1 + $0x70] sm:$0xff]  ;;  %595 = vset.pattern.permute.xlu1 %v598_v0 }
   0x2   :  { %339 = vperm.xlu0 %594, %v321_v1   ;;  %205 = vmatpush.msra.mxu0 %v204_v2  ;;  %v202_v4 = vld [vmem:[%s901_s1 + $0x68] sm:$0xff]  ;;  %v201_v5 = vld [vmem:[%s901_s1 + $0x60] sm:$0xff]  ;;  %v323_v6 = vld [vmem:[%s900_s2 + $0x10] sm:$0xff]  ;;  %v672_v17 = vshrl.u32 %v70_v13, 7  ;;  %v680_v20 = vand.u32 127, %v70_v13 }
   0x3   :  { %544 = vmatpush.msra.mxu1 %v204_v2  ;;  %545 = vmatpush.msra.mxu2 %v204_v2  ;;  %v322_v7 = vld [vmem:[%s900_s2 + $0x8] sm:$0xff]  ;;  %v200_v8 = vld [vmem:[%s901_s1 + $0x58] sm:$0xff]  ;;  %v199_v9 = vld [vmem:[%s901_s1 + $0x50] sm:$0xff] }
   0x4   :  { %546 = vmatpush.msra.mxu3 %v204_v2  ;;  %206 = vmatpush.msra.mxu0 %v203_v3  ;;  %v198_v10 = vld [vmem:[%s901_s1 + $0x48] sm:$0xff]  ;;  %v197_v11 = vld [vmem:[%s901_s1 + $0x40] sm:$0xff]  ;;  %v324_v12 = vld [vmem:[%s900_s2 + $0x18] sm:$0xff]  ;;  %v75_v21 = vadd.s32 32, %v672_v17  ;;  %v79_v23 = vadd.s32 64, %v672_v17  ;;  %v83_v24 = vadd.s32 96, %v672_v17  ;;  %vm109_vm0 = vcmp.eq.s32.totalorder %v672_v17, %v680_v20 }
   0x5   :  { %547 = vmatpush.msra.mxu1 %v203_v3  ;;  %548 = vmatpush.msra.mxu2 %v203_v3  ;;  %v327_v14 = vld [vmem:[%s900_s2 + $0x30] sm:$0xff]  ;;  %v196_v15 = vld [vmem:[%s901_s1 + $0x38] sm:$0xff]  ;;  %v194_v18 = vld [vmem:[%s901_s1 + $0x28] sm:$0xff]  ;;  %v489_v36 = vsel %vm109_vm0, 1.0, %v599_v35  ;;  %v72_v43 = vadd.s32 8, %v672_v17  ;;  %v76_v44 = vadd.s32 40, %v672_v17 }
   0x6   :  { %549 = vmatpush.msra.mxu3 %v203_v3  ;;  %207 = vmatpush.msra.mxu0 %v202_v4  ;;  %v195_v16 = vld [vmem:[%s901_s1 + $0x30] sm:$0xff]  ;;  %v193_v19 = vld [vmem:[%s901_s1 + $0x20] sm:$0xff]  ;;  %v328_v22 = vld [vmem:[%s900_s2 + $0x38] sm:$0xff]  ;;  %vm113_vm1 = vcmp.eq.s32.totalorder %v75_v21, %v680_v20  ;;  %vm117_vm2 = vcmp.eq.s32.totalorder %v79_v23, %v680_v20  ;;  %vm121_vm3 = vcmp.eq.s32.totalorder %v83_v24, %v680_v20  ;;  %v80_v45 = vadd.s32 72, %v672_v17 }
   0x7   :  { %550 = vmatpush.msra.mxu1 %v202_v4  ;;  %551 = vmatpush.msra.mxu2 %v202_v4  ;;  %v330_v25 = vld [vmem:[%s900_s2 + $0x48] sm:$0xff]  ;;  %v192_v26 = vld [vmem:[%s901_s1 + $0x18] sm:$0xff]  ;;  %v697_v27 = vld [vmem:[%s902_s0] sm:$0xff]   ;;  %v493_v37 = vsel %vm113_vm1, 1.0, %v599_v35  ;;  %v497_v41 = vsel %vm117_vm2, 1.0, %v599_v35  ;;  %v501_v42 = vsel %vm121_vm3, 1.0, %v599_v35  ;;  %vm110_vm4 = vcmp.eq.s32.totalorder %v72_v43, %v680_v20 }
   0x8   :  { %552 = vmatpush.msra.mxu3 %v202_v4  ;;  %208 = vmatpush.msra.mxu0 %v201_v5  ;;  %v702_v28 = vld [vmem:[%s902_s0 + $0x10] sm:$0xff]   ;;  %v713_v30 = vld [vmem:[%s902_s0 + $0x20] sm:$0xff]   ;;  %v190_v32 = vld [vmem:[%s901_s1 + $0x8] sm:$0xff]  ;;  %v507_v33 = vunpack.c.l.bf16 %v697_v27  ;;  %v84_v46 = vadd.s32 104, %v672_v17  ;;  %vm114_vm5 = vcmp.eq.s32.totalorder %v76_v44, %v680_v20  ;;  %vm118_vm6 = vcmp.eq.s32.totalorder %v80_v45, %v680_v20 }
   0x9   :  { %553 = vmatpush.msra.mxu1 %v201_v5  ;;  %554 = vmatpush.msra.mxu2 %v201_v5  ;;  %v191_v29 = vld [vmem:[%s901_s1 + $0x10] sm:$0xff]  ;;  %v515_v34 = vunpack.c.l.bf16 %v702_v28  ;;  %v523_v38 = vunpack.c.l.bf16 %v713_v30  ;;  %v189_v40 = vld [vmem:[%s901_s1] sm:$0xff]  ;;  %v508_v54 = vunpack.c.h.bf16 %v697_v27  ;;  %v516_v55 = vunpack.c.h.bf16 %v702_v28  ;;  %v332_v43 = vld [vmem:[%s900_s2 + $0x58] sm:$0xff] }
   0xa   :  { %555 = vmatpush.msra.mxu3 %v201_v5  ;;  %349 = vperm.xlu1 %595, %v323_v6   ;;  %v718_v31 = vld [vmem:[%s902_s0 + $0x30] sm:$0xff]   ;;  %v157_v47 = vadd.f32 %v507_v33, %v489_v36  ;;  %v325_v51 = vld [vmem:[%s900_s2 + $0x20] sm:$0xff]  ;;  %vm122_vm7 = vcmp.eq.s32.totalorder %v84_v46, %v680_v20  ;;  %v490_v56 = vsel %vm110_vm4, 1.0, %v599_v35  ;;  %v494_v57 = vsel %vm114_vm5, 1.0, %v599_v35  ;;  %v537_v6 = vld [vmem:[%s902_s0 + $0x8] sm:$0xff]  }
   0xb   :  { %344 = vperm.xlu0 %594, %v322_v7   ;;  %209 = vmatpush.msra.mxu0 %v200_v8  ;;  %v531_v39 = vunpack.c.l.bf16 %v718_v31  ;;  %v161_v48 = vadd.f32 %v515_v34, %v493_v37  ;;  %v165_v49 = vadd.f32 %v523_v38, %v497_v41  ;;  %v331_v52 = vld [vmem:[%s900_s2 + $0x50] sm:$0xff]  ;;  %v333_v53 = vld [vmem:[%s900_s2 + $0x60] sm:$0xff]  ;;  %v524_v58 = vunpack.c.h.bf16 %v713_v30  ;;  %v539_v7 = vld [vmem:[%s902_s0 + $0x18] sm:$0xff]  }
   0xc   :  { %556 = vmatpush.msra.mxu1 %v200_v8  ;;  %557 = vmatpush.msra.mxu2 %v200_v8  ;;  %v532_v59 = vunpack.c.h.bf16 %v718_v31  ;;  %v498_v60 = vsel %vm118_vm6, 1.0, %v599_v35  ;;  %v502_v61 = vsel %vm122_vm7, 1.0, %v599_v35  ;;  %v73_v62 = vadd.s32 16, %v672_v17  ;;  %v329_v31 = vld [vmem:[%s900_s2 + $0x40] sm:$0xff]  ;;  %v335_v44 = vld [vmem:[%s900_s2 + $0x70] sm:$0xff] }
   0xd   :  { %558 = vmatpush.msra.mxu3 %v200_v8  ;;  %210 = vmatpush.msra.mxu0 %v199_v9  ;;  %v169_v50 = vadd.f32 %v531_v39, %v501_v42  ;;  %v77_v63 = vadd.s32 48, %v672_v17  ;;  %v85_v1 = vadd.s32 112, %v672_v17  ;;  %v158_v2 = vadd.f32 %v508_v54, %v490_v56  ;;  %v541_v8 = vld [vmem:[%s902_s0 + $0x28] sm:$0xff]  }
   0xe   :  { %559 = vmatpush.msra.mxu1 %v199_v9  ;;  %560 = vmatpush.msra.mxu2 %v199_v9  ;;  %v162_v3 = vadd.f32 %v516_v55, %v494_v57  ;;  %v166_v4 = vadd.f32 %v524_v58, %v498_v60  ;;  %v170_v5 = vadd.f32 %v532_v59, %v502_v61  ;;  %v511_v13 = vunpack.c.l.bf16 %v537_v6 }
   0xf   :  { %561 = vmatpush.msra.mxu3 %v199_v9  ;;  %211 = vmatpush.msra.mxu0 %v198_v10  ;;  %vm111_vm8 = vcmp.eq.s32.totalorder %v73_v62, %v680_v20  ;;  %vm115_vm9 = vcmp.eq.s32.totalorder %v77_v63, %v680_v20  ;;  %v543_v9 = vld [vmem:[%s902_s0 + $0x38] sm:$0xff]   ;;  %vm123_vm11 = vcmp.eq.s32.totalorder %v85_v1, %v680_v20  ;;  %v74_v23 = vadd.s32 24, %v672_v17 }
  0x10   :  { %562 = vmatpush.msra.mxu1 %v198_v10  ;;  %563 = vmatpush.msra.mxu2 %v198_v10  ;;  %v78_v24 = vadd.s32 56, %v672_v17  ;;  %v528_v36 = vunpack.c.h.bf16 %v541_v8  ;;  %v536_v37 = vunpack.c.h.bf16 %v543_v9 }
  0x11   :  { %564 = vmatpush.msra.mxu3 %v198_v10  ;;  %212 = vmatpush.msra.mxu0 %v197_v11  ;;  %v326_v10 = vld [vmem:[%s900_s2 + $0x28] sm:$0xff]  ;;  %vm112_vm12 = vcmp.eq.s32.totalorder %v74_v23, %v680_v20 }
  0x12   :  { %565 = vmatpush.msra.mxu1 %v197_v11  ;;  %566 = vmatpush.msra.mxu2 %v197_v11  ;;  %vm116_vm13 = vcmp.eq.s32.totalorder %v78_v24, %v680_v20  ;;  %v492_v33 = vsel %vm112_vm12, 1.0, %v599_v35 }
  0x13   :  { %567 = vmatpush.msra.mxu3 %v197_v11  ;;  %354 = vperm.xlu1 %595, %v324_v12   ;;  %v334_v11 = vld [vmem:[%s900_s2 + $0x68] sm:$0xff]  ;;  %v336_v12 = vld [vmem:[%s900_s2 + $0x78] sm:$0xff]  ;;  %v496_v34 = vsel %vm116_vm13, 1.0, %v599_v35 }
  0x14   :  { %369 = vperm.xlu0 %594, %v327_v14   ;;  %213 = vmatpush.msra.mxu0 %v196_v15  ;;  %v519_v14 = vunpack.c.l.bf16 %v539_v7 }
  0x15   :  { %568 = vmatpush.msra.mxu1 %v196_v15  ;;  %569 = vmatpush.msra.mxu2 %v196_v15 }
  0x16   :  { %570 = vmatpush.msra.mxu3 %v196_v15  ;;  %214 = vmatpush.msra.mxu0 %v195_v16  ;;  %v491_v15 = vsel %vm111_vm8, 1.0, %v599_v35 }
  0x17   :  { %571 = vmatpush.msra.mxu1 %v195_v16  ;;  %572 = vmatpush.msra.mxu2 %v195_v16  ;;  %v159_v27 = vadd.f32 %v511_v13, %v491_v15 }
  0x18   :  { %573 = vmatpush.msra.mxu3 %v195_v16  ;;  %215 = vmatpush.msra.mxu0 %v194_v18  ;;  %v495_v16 = vsel %vm115_vm9, 1.0, %v599_v35 }
  0x19   :  { %574 = vmatpush.msra.mxu1 %v194_v18  ;;  %575 = vmatpush.msra.mxu2 %v194_v18  ;;  %v163_v28 = vadd.f32 %v519_v14, %v495_v16 }
  0x1a   :  { %576 = vmatpush.msra.mxu3 %v194_v18  ;;  %216 = vmatpush.msra.mxu0 %v193_v19  ;;  %v527_v18 = vunpack.c.l.bf16 %v541_v8 }
  0x1b   :  { %577 = vmatpush.msra.mxu1 %v193_v19  ;;  %578 = vmatpush.msra.mxu2 %v193_v19 }
  0x1c   :  { %579 = vmatpush.msra.mxu3 %v193_v19  ;;  %374 = vperm.xlu1 %595, %v328_v22   ;;  %v535_v19 = vunpack.c.l.bf16 %v543_v9  ;;  %v503_v22 = vsel %vm123_vm11, 1.0, %v599_v35 }
  0x1d   :  { %384 = vperm.xlu0 %594, %v330_v25   ;;  %217 = vmatpush.msra.mxu0 %v192_v26  ;;  %v82_v25 = vadd.s32 88, %v672_v17 }
  0x1e   :  { %580 = vmatpush.msra.mxu1 %v192_v26  ;;  %581 = vmatpush.msra.mxu2 %v192_v26  ;;  %v171_v30 = vadd.f32 %v535_v19, %v503_v22 }
  0x1f   :  { %582 = vmatpush.msra.mxu3 %v192_v26  ;;  %218 = vmatpush.msra.mxu0 %v191_v29  ;;  %v86_v26 = vadd.s32 120, %v672_v17  ;;  %vm120_vm14 = vcmp.eq.s32.totalorder %v82_v25, %v680_v20 }
  0x20   :  { %583 = vmatpush.msra.mxu1 %v191_v29  ;;  %584 = vmatpush.msra.mxu2 %v191_v29  ;;  %v500_v38 = vsel %vm120_vm14, 1.0, %v599_v35 }
  0x21   :  { %585 = vmatpush.msra.mxu3 %v191_v29  ;;  %219 = vmatpush.msra.mxu0 %v190_v32  ;;  %vm124_vm15 = vcmp.eq.s32.totalorder %v86_v26, %v680_v20 }
  0x22   :  { %586 = vmatpush.msra.mxu1 %v190_v32  ;;  %587 = vmatpush.msra.mxu2 %v190_v32  ;;  %v504_v39 = vsel %vm124_vm15, 1.0, %v599_v35 }
  0x23   :  { %588 = vmatpush.msra.mxu3 %v190_v32  ;;  %220 = vmatpush.msra.mxu0 %v189_v40  ;;  %v512_v32 = vunpack.c.h.bf16 %v537_v6  ;;  %v172_v42 = vadd.f32 %v536_v37, %v504_v39 }
  0x24   :  { %589 = vmatpush.msra.mxu1 %v189_v40  ;;  %590 = vmatpush.msra.mxu2 %v189_v40 }
  0x25   :  { %591 = vmatpush.msra.mxu3 %v189_v40  ;;  %596 = vset.pattern.permute.xlu2 %v598_v0  ;;  %v81_v0 = vadd.s32 80, %v672_v17  ;;  %v520_v17 = vunpack.c.h.bf16 %v539_v7  ;;  %v160_v40 = vadd.f32 %v512_v32, %v492_v33 }
  0x26   :  { %221 = vmatmul.f32.vlgmr.msra.gmra.mxu0 %v157_v47  ;;  %233 = vmatmul.f32.vlgmr.msra.gmra.mxu1 %v161_v48 }
  0x27   :  { %245 = vmatmul.f32.vlgmr.msra.gmra.mxu2 %v165_v49  ;;  %257 = vmatmul.f32.vlgmr.msra.gmra.mxu3 %v169_v50  ;;  %vm119_vm10 = vcmp.eq.s32.totalorder %v81_v0, %v680_v20  ;;  %v164_v41 = vadd.f32 %v520_v17, %v496_v34  ;;  %v168_v20 = vadd.f32 %v528_v36, %v500_v38 }
  0x28   :  { %359 = vperm.xlu2 %596, %v325_v51   ;;  %389 = vperm.xlu1 %595, %v331_v52   ;;  %v499_v21 = vsel %vm119_vm10, 1.0, %v599_v35 }
  0x29   :  { %399 = vperm.xlu0 %594, %v333_v53   ;;  %v167_v29 = vadd.f32 %v527_v18, %v499_v21  ;;  %v832_v53 = vld [vmem:[%s903_s3] ss:$0 sm:$0xff] }
  0x2e   :  { %224 = vmatmul.f32.gmra.mxu0 %v158_v2  ;;  %236 = vmatmul.f32.gmra.mxu1 %v162_v3 }
  0x2f   :  { %248 = vmatmul.f32.gmra.mxu2 %v166_v4  ;;  %260 = vmatmul.f32.gmra.mxu3 %v170_v5 }
  0x30   :  { %364 = vperm.xlu2 %596, %v326_v10   ;;  %404 = vperm.xlu1 %595, %v334_v11  }
  0x31   :  { %414 = vperm.xlu0 %594, %v336_v12  }
  0x36   :  { %227 = vmatmul.f32.gmra.mxu0 %v159_v27  ;;  %239 = vmatmul.f32.gmra.mxu1 %v163_v28 }
  0x37   :  { %251 = vmatmul.f32.gmra.mxu2 %v167_v29  ;;  %263 = vmatmul.f32.gmra.mxu3 %v171_v30 }
  0x38   :  { %379 = vperm.xlu2 %596, %v329_v31  }
  0x3e   :  { %230 = vmatmul.f32.gmra.mxu0 %v160_v40  ;;  %242 = vmatmul.f32.gmra.mxu1 %v164_v41 }
  0x3f   :  { %254 = vmatmul.f32.gmra.mxu2 %v168_v20  ;;  %266 = vmatmul.f32.gmra.mxu3 %v172_v42 }
  0x40   :  { %394 = vperm.xlu2 %596, %v332_v43  }
  0x48   :  { %409 = vperm.xlu2 %596, %v335_v44  }
  0x74   :  { %v340_v45 = vpop.permute.xlu0 %339 }
  0x7c   :  { %v350_v35 = vpop.permute.xlu1 %349 }
  0x7d   :  { %v345_v46 = vpop.permute.xlu0 %344 }
  0x82   :  { %v360_v47 = vpop.permute.xlu2 %359 }
  0x85   :  { %v825_v48 = vpop.permute.xlu1 %354 }
  0x86   :  { %v370_v49 = vpop.permute.xlu0 %369 }
  0x8a   :  { %v365_v50 = vpop.permute.xlu2 %364 }
  0x8e   :  { %v827_v51 = vpop.permute.xlu1 %374 }
  0x8f   :  { %v385_v52 = vpop.permute.xlu0 %384 }
  0x92   :  { %v380_v57 = vpop.permute.xlu2 %379 }
  0x9a   :  { %v390_v60 = vpop.permute.xlu1 %389  ;;  %v395_v12 = vpop.permute.xlu2 %394 }
  0x9b   :  { %v400_v63 = vpop.permute.xlu0 %399 }
  0xa2   :  { %v405_v18 = vpop.permute.xlu1 %404  ;;  %v410_v36 = vpop.permute.xlu2 %409 }
  0xa3   :  { %v222_v54 = vpop.f32.mrf.mxu0  ;;  %v234_v56 = vpop.f32.mrf.mxu1 }
  0xa4   :  { %v417_v55 = vmul.f32 %v340_v45, %v222_v54  ;;  %v421_v58 = vmul.f32 %v360_v47, %v234_v56  ;;  %v415_v54 = vpop.permute.xlu0 %414 }
  0xa6   :  { %v437_v59 = vadd.f32 %v832_v53, %v417_v55  ;;  %v441_v61 = vadd.f32 %v832_v53, %v421_v58 }
  0xa8   :  { %v453_v62 = vmax.f32 %v437_v59, 0.0  ;;  %v457_v0 = vmax.f32 %v441_v61, 0.0 }
  0xaa   :  { %469 = vst [vmem:[%s904_s4] sm:$0xff] %v453_v62  ;;  %v246_v1 = vpop.f32.mrf.mxu2  ;;  %v258_v2 = vpop.f32.mrf.mxu3 }
  0xab   :  { %473 = vst [vmem:[%s904_s4 + $0x20] sm:$0xff] %v457_v0  ;;  %v425_v3 = vmul.f32 %v380_v57, %v246_v1  ;;  %v429_v4 = vmul.f32 %v400_v63, %v258_v2  ;;  %v225_v5 = vpop.f32.mrf.mxu0  ;;  %v237_v7 = vpop.f32.mrf.mxu1 }
  0xac   :  { %v418_v6 = vmul.f32 %v345_v46, %v225_v5  ;;  %v422_v10 = vmul.f32 %v365_v50, %v237_v7 }
  0xad   :  { %v445_v8 = vadd.f32 %v832_v53, %v425_v3  ;;  %v449_v9 = vadd.f32 %v832_v53, %v429_v4 }
  0xae   :  { %v438_v11 = vadd.f32 %v832_v53, %v418_v6  ;;  %v442_v15 = vadd.f32 %v832_v53, %v422_v10 }
  0xaf   :  { %v461_v13 = vmax.f32 %v445_v8, 0.0  ;;  %v465_v14 = vmax.f32 %v449_v9, 0.0 }
  0xb0   :  { %v454_v16 = vmax.f32 %v438_v11, 0.0  ;;  %v458_v19 = vmax.f32 %v442_v15, 0.0 }
  0xb1   :  { %477 = vst [vmem:[%s904_s4 + $0x40] sm:$0xff] %v461_v13 }
  0xb2   :  { %481 = vst [vmem:[%s904_s4 + $0x60] sm:$0xff] %v465_v14  ;;  %v249_v21 = vpop.f32.mrf.mxu2  ;;  %v261_v22 = vpop.f32.mrf.mxu3 }
  0xb3   :  { %470 = vst [vmem:[%s904_s4 + $0x8] sm:$0xff] %v454_v16  ;;  %v426_v23 = vmul.f32 %v385_v52, %v249_v21  ;;  %v430_v24 = vmul.f32 %v405_v18, %v261_v22  ;;  %v228_v25 = vpop.f32.mrf.mxu0  ;;  %v240_v27 = vpop.f32.mrf.mxu1 }
  0xb4   :  { %474 = vst [vmem:[%s904_s4 + $0x28] sm:$0xff] %v458_v19  ;;  %v419_v26 = vmul.f32 %v350_v35, %v228_v25  ;;  %v423_v30 = vmul.f32 %v370_v49, %v240_v27 }
  0xb5   :  { %v446_v28 = vadd.f32 %v832_v53, %v426_v23  ;;  %v450_v29 = vadd.f32 %v832_v53, %v430_v24 }
  0xb6   :  { %v439_v31 = vadd.f32 %v832_v53, %v419_v26  ;;  %v443_v33 = vadd.f32 %v832_v53, %v423_v30 }
  0xb7   :  { %v462_v32 = vmax.f32 %v446_v28, 0.0  ;;  %v466_v17 = vmax.f32 %v450_v29, 0.0 }
  0xb8   :  { %v455_v34 = vmax.f32 %v439_v31, 0.0  ;;  %v459_v37 = vmax.f32 %v443_v33, 0.0 }
  0xb9   :  { %478 = vst [vmem:[%s904_s4 + $0x48] sm:$0xff] %v462_v32 }
  0xba   :  { %482 = vst [vmem:[%s904_s4 + $0x68] sm:$0xff] %v466_v17  ;;  %v252_v38 = vpop.f32.mrf.mxu2  ;;  %v264_v39 = vpop.f32.mrf.mxu3 }
  0xbb   :  { %471 = vst [vmem:[%s904_s4 + $0x10] sm:$0xff] %v455_v34  ;;  %v427_v40 = vmul.f32 %v390_v60, %v252_v38  ;;  %v431_v41 = vmul.f32 %v410_v36, %v264_v39  ;;  %v231_v20 = vpop.f32.mrf.mxu0  ;;  %v243_v43 = vpop.f32.mrf.mxu1 }
  0xbc   :  { %475 = vst [vmem:[%s904_s4 + $0x30] sm:$0xff] %v459_v37  ;;  %v420_v42 = vmul.f32 %v825_v48, %v231_v20  ;;  %v424_v35 = vmul.f32 %v827_v51, %v243_v43 }
  0xbd   :  { %v447_v44 = vadd.f32 %v832_v53, %v427_v40  ;;  %v451_v45 = vadd.f32 %v832_v53, %v431_v41 }
  0xbe   :  { %v440_v46 = vadd.f32 %v832_v53, %v420_v42  ;;  %v444_v50 = vadd.f32 %v832_v53, %v424_v35 }
  0xbf   :  { %v463_v47 = vmax.f32 %v447_v44, 0.0  ;;  %v467_v49 = vmax.f32 %v451_v45, 0.0 }
  0xc0   :  { %v456_v52 = vmax.f32 %v440_v46, 0.0  ;;  %v460_v48 = vmax.f32 %v444_v50, 0.0 }
  0xc1   :  { %479 = vst [vmem:[%s904_s4 + $0x50] sm:$0xff] %v463_v47 }
  0xc2   :  { %483 = vst [vmem:[%s904_s4 + $0x70] sm:$0xff] %v467_v49  ;;  %v255_v55 = vpop.f32.mrf.mxu2  ;;  %v267_v56 = vpop.f32.mrf.mxu3 }
  0xc3   :  { %472 = vst [vmem:[%s904_s4 + $0x18] sm:$0xff] %v456_v52  ;;  %v428_v51 = vmul.f32 %v395_v12, %v255_v55  ;;  %v432_v57 = vmul.f32 %v415_v54, %v267_v56 }
  0xc4   :  { %476 = vst [vmem:[%s904_s4 + $0x38] sm:$0xff] %v460_v48 }
  0xc5   :  { %v448_v58 = vadd.f32 %v832_v53, %v428_v51  ;;  %v452_v59 = vadd.f32 %v832_v53, %v432_v57 }
  0xc7   :  { %v464_v60 = vmax.f32 %v448_v58, 0.0  ;;  %v468_v61 = vmax.f32 %v452_v59, 0.0 }
  0xc9   :  { %480 = vst [vmem:[%s904_s4 + $0x58] sm:$0xff] %v464_v60 }
  0xca   :  { %484 = vst [vmem:[%s904_s4 + $0x78] sm:$0xff] %v468_v61 }

// kernel: graph_encoder_forward.17
= control target key start
LH: loop header
LB: loop body
LE: loop exit
PB: predicated region body
PF: predicated region fallthrough
CT: control target
= control target key end

     0   :  { %v61_v0 = vlaneseq  ;;  %s2425_s1 = inlined_call_operand.vmem [shape: f32[8,128], index: 1, kind: input, shape index: {}]   ;;  %s2426_s0 = inlined_call_operand.vmem [shape: f32[128,128], index: 0, kind: input, shape index: {}]   ;;  %s2427_s2 = inlined_call_operand.vmem [shape: f32[8,1], index: 2, kind: input, shape index: {}]   ;;  %s2428_s3 = inlined_call_operand.vmem [shape: f32[8,256], index: 3, kind: output, shape index: {}]  }
   0x1   :  { %v1732_v4 = vld [vmem:[%s2425_s1] sm:$0xff]  ;;  %v1842_v26 = vld [vmem:[%s2426_s0 + $0x10] sm:$0xff]  ;;  %v1854_v28 = vld [vmem:[%s2426_s0 + $0x18] sm:$0xff] }
   0x2   :  { %v1720_v1 = vshrl.u32 %v61_v0, 7  ;;  %v1737_v5 = vperm.slane %v1732_v4, 0  ;;  %v1743_v6 = vperm.slane %v1732_v4, 3  ;;  %v1797_v16 = vperm.slane %v1732_v4, 4  ;;  %v1847_v27 = vld [vmem:[%s2426_s0 + $0x20] sm:$0xff]  ;;  %v1862_v33 = vld [vmem:[%s2426_s0 + $0x28] sm:$0xff] }
   0x3   :  { %v1815_v19 = vperm.slane %v1732_v4, 1  ;;  %v1827_v20 = vperm.slane %v1732_v4, 5  ;;  %v1871_v37 = vld [vmem:[%s2426_s0 + $0x30] sm:$0xff]  ;;  %v1876_v38 = vld [vmem:[%s2426_s0 + $0x38] sm:$0xff]  ;;  %v1892_v48 = vld [vmem:[%s2426_s0 + $0x48] sm:$0xff] }
   0x4   :  { %1562 = vset.pattern.permute.xlu0 %v1720_v1  ;;  %v1724_v2 = vadd.s32 16, %v1720_v1  ;;  %v1727_v3 = vadd.s32 32, %v1720_v1  ;;  %v1746_v7 = vadd.s32 24, %v1720_v1  ;;  %v1750_v8 = vadd.s32 40, %v1720_v1  ;;  %v1897_v49 = vld [vmem:[%s2426_s0 + $0x50] sm:$0xff]  ;;  %v1904_v54 = vld [vmem:[%s2426_s0 + $0x78] sm:$0xff] }
   0x5   :  { %v1758_v9 = vadd.s32 48, %v1720_v1  ;;  %v1761_v10 = vadd.s32 56, %v1720_v1  ;;  %v1767_v11 = vadd.s32 80, %v1720_v1  ;;  %v1773_v12 = vadd.s32 72, %v1720_v1  ;;  %38 = vmatpush.msra.mxu0 %v1904_v54  ;;  %v1913_v56 = vld [vmem:[%s2426_s0 + $0x70] sm:$0xff]  ;;  %v1924_v59 = vld [vmem:[%s2426_s0 + $0x58] sm:$0xff] }
   0x6   :  { %1563 = vset.pattern.permute.xlu1 %v1724_v2  ;;  %1565 = vset.pattern.permute.xlu2 %v1727_v3  ;;  %v1779_v13 = vadd.s32 120, %v1720_v1  ;;  %v1785_v14 = vadd.s32 88, %v1720_v1  ;;  %v1788_v15 = vadd.s32 96, %v1720_v1  ;;  %v1800_v17 = vadd.s32 112, %v1720_v1  ;;  %v1929_v60 = vld [vmem:[%s2426_s0 + $0x60] sm:$0xff] }
   0x7   :  { %v1809_v18 = vadd.s32 8, %v1720_v1  ;;  %v1833_v21 = vadd.s32 64, %v1720_v1  ;;  %v1879_v40 = vadd.s32 104, %v1720_v1  ;;  %39 = vmatpush.msra.mxu0 %v1913_v56  ;;  %v1936_v63 = vld [vmem:[%s2426_s0] sm:$0xff] }
   0xc   :  { %65 = vperm.xlu0 %1562, %v1737_v5  }
   0xe   :  { %77 = vperm.xlu1 %1563, %v1737_v5   ;;  %89 = vperm.xlu2 %1565, %v1737_v5  }
  0x14   :  { %356 = vperm.xlu0 %1562, %v1743_v6  }
  0x16   :  { %1564 = vset.pattern.permute.xlu1 %v1746_v7  ;;  %1566 = vset.pattern.permute.xlu2 %v1750_v8 }
  0x1c   :  { %1605 = vset.pattern.permute.xlu0 %v1750_v8 }
  0x1e   :  { %83 = vperm.xlu1 %1564, %v1737_v5   ;;  %95 = vperm.xlu2 %1566, %v1737_v5  }
  0x24   :  { %386 = vperm.xlu0 %1605, %v1743_v6  }
  0x26   :  { %1567 = vset.pattern.permute.xlu1 %v1758_v9  ;;  %1568 = vset.pattern.permute.xlu2 %v1761_v10 }
  0x2c   :  { %1610 = vset.pattern.permute.xlu0 %v1767_v11 }
  0x2e   :  { %101 = vperm.xlu1 %1567, %v1737_v5   ;;  %107 = vperm.xlu2 %1568, %v1737_v5  }
  0x34   :  { %416 = vperm.xlu0 %1610, %v1743_v6  }
  0x36   :  { %1569 = vset.pattern.permute.xlu1 %v1773_v12  ;;  %1570 = vset.pattern.permute.xlu2 %v1767_v11 }
  0x3c   :  { %1615 = vset.pattern.permute.xlu0 %v1779_v13 }
  0x3e   :  { %119 = vperm.xlu1 %1569, %v1737_v5   ;;  %125 = vperm.xlu2 %1570, %v1737_v5  }
  0x44   :  { %446 = vperm.xlu0 %1615, %v1743_v6  }
  0x46   :  { %1571 = vset.pattern.permute.xlu1 %v1785_v14  ;;  %1572 = vset.pattern.permute.xlu2 %v1788_v15 }
  0x4c   :  { %1620 = vset.pattern.permute.xlu0 %v1727_v3 }
  0x4e   :  { %131 = vperm.xlu1 %1571, %v1737_v5   ;;  %137 = vperm.xlu2 %1572, %v1737_v5  }
  0x54   :  { %477 = vperm.xlu0 %1620, %v1797_v16  }
  0x56   :  { %1573 = vset.pattern.permute.xlu1 %v1800_v17  ;;  %1574 = vset.pattern.permute.xlu2 %v1779_v13 }
  0x5c   :  { %1625 = vset.pattern.permute.xlu0 %v1773_v12 }
  0x5e   :  { %149 = vperm.xlu1 %1573, %v1737_v5   ;;  %155 = vperm.xlu2 %1574, %v1737_v5  }
  0x64   :  { %507 = vperm.xlu0 %1625, %v1797_v16  }
  0x66   :  { %1575 = vset.pattern.permute.xlu1 %v1720_v1  ;;  %1576 = vset.pattern.permute.xlu2 %v1809_v18 }
  0x68   :  { %v90_v23 = vpop.permute.xlu2 %89 }
  0x69   :  { %vm840_vm1 = vcmp.gt.f32.partialorder %v90_v23, 0.0 }
  0x6a   :  { %v1224_v30 = vsel %vm840_vm1, %v1847_v27, -inf }
  0x6c   :  { %1630 = vset.pattern.permute.xlu0 %v1800_v17 }
  0x6e   :  { %162 = vperm.xlu1 %1575, %v1815_v19   ;;  %168 = vperm.xlu2 %1576, %v1815_v19  }
  0x74   :  { %537 = vperm.xlu0 %1630, %v1797_v16  }
  0x76   :  { %1577 = vset.pattern.permute.xlu1 %v1746_v7  ;;  %1578 = vset.pattern.permute.xlu2 %v1727_v3 }
  0x78   :  { %v96_v25 = vpop.permute.xlu2 %95 }
  0x79   :  { %vm841_vm3 = vcmp.gt.f32.partialorder %v96_v25, 0.0 }
  0x7a   :  { %v1225_v36 = vsel %vm841_vm3, %v1862_v33, -inf }
  0x7c   :  { %1635 = vset.pattern.permute.xlu0 %v1746_v7 }
  0x7e   :  { %180 = vperm.xlu1 %1577, %v1815_v19   ;;  %186 = vperm.xlu2 %1578, %v1815_v19   ;;  %v66_v47 = vpop.permute.xlu0 %65 }
  0x7f   :  { %vm836_vm10 = vcmp.gt.f32.partialorder %v66_v47, 0.0 }
  0x80   :  { %v78_v22 = vpop.permute.xlu1 %77 }
  0x81   :  { %vm838_vm0 = vcmp.gt.f32.partialorder %v78_v22, 0.0 }
  0x82   :  { %v1222_v29 = vsel %vm838_vm0, %v1842_v26, -inf }
  0x83   :  { %v1349_v32 = vmax.f32 %v1224_v30, %v1222_v29  ;;  %v1945_v30 = vperm.slane %v1732_v4, 6 }
  0x84   :  { %568 = vperm.xlu0 %1635, %v1827_v20  }
  0x86   :  { %1579 = vset.pattern.permute.xlu1 %v1750_v8  ;;  %1580 = vset.pattern.permute.xlu2 %v1758_v9  ;;  %v1915_v57 = vpop.permute.xlu0 %356 }
  0x88   :  { %v108_v34 = vpop.permute.xlu2 %107 }
  0x89   :  { %vm843_vm4 = vcmp.gt.f32.partialorder %v108_v34, 0.0  ;;  %v1951_v34 = vperm.slane %v1732_v4, 2 }
  0x8a   :  { %v1227_v43 = vsel %vm843_vm4, %v1876_v38, -inf }
  0x8c   :  { %1636 = vset.pattern.permute.xlu0 %v1833_v21 }
  0x8e   :  { %192 = vperm.xlu1 %1579, %v1815_v19   ;;  %198 = vperm.xlu2 %1580, %v1815_v19  }
  0x90   :  { %v84_v24 = vpop.permute.xlu1 %83 }
  0x91   :  { %vm839_vm2 = vcmp.gt.f32.partialorder %v84_v24, 0.0  ;;  %v1220_v24 = vsel %vm836_vm10, %v1936_v63, -inf }
  0x92   :  { %v1223_v31 = vsel %vm839_vm2, %v1854_v28, -inf }
  0x93   :  { %v1350_v35 = vmax.f32 %v1349_v32, %v1223_v31 }
  0x94   :  { %113 = vperm.xlu0 %1636, %v1737_v5  }
  0x95   :  { %v1351_v41 = vmax.f32 %v1350_v35, %v1225_v36 }
  0x96   :  { %1581 = vset.pattern.permute.xlu1 %v1833_v21  ;;  %1582 = vset.pattern.permute.xlu2 %v1773_v12  ;;  %v1931_v62 = vpop.permute.xlu0 %386 }
  0x98   :  { %v126_v46 = vpop.permute.xlu2 %125 }
  0x99   :  { %vm846_vm6 = vcmp.gt.f32.partialorder %v126_v46, 0.0 }
  0x9a   :  { %v1230_v52 = vsel %vm846_vm6, %v1897_v49, -inf }
  0x9c   :  { %598 = vperm.xlu0 %1636, %v1827_v20  }
  0x9e   :  { %210 = vperm.xlu1 %1581, %v1815_v19   ;;  %216 = vperm.xlu2 %1582, %v1815_v19  }
  0xa0   :  { %v102_v39 = vpop.permute.xlu1 %101 }
  0xa1   :  { %vm842_vm5 = vcmp.gt.f32.partialorder %v102_v39, 0.0 }
  0xa2   :  { %v1226_v42 = vsel %vm842_vm5, %v1871_v37, -inf }
  0xa3   :  { %v1352_v44 = vmax.f32 %v1351_v41, %v1226_v42 }
  0xa4   :  { %1641 = vset.pattern.permute.xlu0 %v1879_v40 }
  0xa5   :  { %v1353_v45 = vmax.f32 %v1352_v44, %v1227_v43 }
  0xa6   :  { %1583 = vset.pattern.permute.xlu1 %v1767_v11  ;;  %1584 = vset.pattern.permute.xlu2 %v1785_v14  ;;  %v1947_v31 = vpop.permute.xlu0 %416 }
  0xa8   :  { %v138_v58 = vpop.permute.xlu2 %137 }
  0xa9   :  { %vm848_vm8 = vcmp.gt.f32.partialorder %v138_v58, 0.0 }
  0xaa   :  { %v1232_v22 = vsel %vm848_vm8, %v1929_v60, -inf }
  0xac   :  { %143 = vperm.xlu0 %1641, %v1737_v5  }
  0xae   :  { %222 = vperm.xlu1 %1583, %v1815_v19   ;;  %228 = vperm.xlu2 %1584, %v1815_v19  }
  0xb0   :  { %v120_v50 = vpop.permute.xlu1 %119 }
  0xb1   :  { %vm845_vm7 = vcmp.gt.f32.partialorder %v120_v50, 0.0 }
  0xb2   :  { %v1229_v51 = vsel %vm845_vm7, %v1892_v48, -inf }
  0xb3   :  { %v1354_v53 = vmax.f32 %v1353_v45, %v1229_v51  ;;  %v1968_v45 = vld [vmem:[%s2426_s0 + $0x8] sm:$0xff] }
  0xb4   :  { %628 = vperm.xlu0 %1641, %v1827_v20  }
  0xb5   :  { %v1355_v55 = vmax.f32 %v1354_v53, %v1230_v52 }
  0xb6   :  { %1585 = vset.pattern.permute.xlu1 %v1879_v40  ;;  %1586 = vset.pattern.permute.xlu2 %v1800_v17  ;;  %v1958_v42 = vpop.permute.xlu0 %446 }
  0xb8   :  { %v156_v32 = vpop.permute.xlu2 %155 }
  0xb9   :  { %vm851_vm11 = vcmp.gt.f32.partialorder %v156_v32, 0.0  ;;  %v1999_v32 = vld [vmem:[%s2426_s0 + $0x68] sm:$0xff] }
  0xba   :  { %v1235_v39 = vsel %vm851_vm11, %v1904_v54, -inf  ;;  %40 = vmatpush.msra.mxu0 %v1999_v32 }
  0xbc   :  { %1646 = vset.pattern.permute.xlu0 %v1724_v2  ;;  %41 = vmatpush.msra.mxu0 %v1929_v60 }
  0xbe   :  { %240 = vperm.xlu1 %1585, %v1815_v19   ;;  %246 = vperm.xlu2 %1586, %v1815_v19  }
  0xbf   :  { %42 = vmatpush.msra.mxu0 %v1924_v59 }
  0xc0   :  { %v132_v61 = vpop.permute.xlu1 %131 }
  0xc1   :  { %vm847_vm9 = vcmp.gt.f32.partialorder %v132_v61, 0.0  ;;  %43 = vmatpush.msra.mxu0 %v1897_v49 }
  0xc2   :  { %v1231_v0 = vsel %vm847_vm9, %v1924_v59, -inf }
  0xc3   :  { %v1356_v23 = vmax.f32 %v1355_v55, %v1231_v0  ;;  %44 = vmatpush.msra.mxu0 %v1892_v48 }
  0xc4   :  { %174 = vperm.xlu0 %1646, %v1815_v19  }
  0xc5   :  { %v1357_v25 = vmax.f32 %v1356_v23, %v1232_v22 }
  0xc6   :  { %1587 = vset.pattern.permute.xlu1 %v1779_v13  ;;  %1588 = vset.pattern.permute.xlu2 %v1720_v1  ;;  %v1972_v46 = vpop.permute.xlu0 %477 }
  0xc7   :  { %v1358_v29 = vmax.f32 %v1357_v25, %v1220_v24 }
  0xc8   :  { %v169_v44 = vpop.permute.xlu2 %168 }
  0xc9   :  { %vm853_vm13 = vcmp.gt.f32.partialorder %v169_v44, 0.0  ;;  %v2010_v44 = vld [vmem:[%s2426_s0 + $0x40] sm:$0xff] }
  0xca   :  { %v1237_v47 = vsel %vm853_vm13, %v1968_v45, -inf  ;;  %45 = vmatpush.msra.mxu0 %v2010_v44 }
  0xcc   :  { %659 = vperm.xlu0 %1646, %v1945_v30   ;;  %46 = vmatpush.msra.mxu0 %v1876_v38 }
  0xce   :  { %252 = vperm.xlu1 %1587, %v1815_v19   ;;  %259 = vperm.xlu2 %1588, %v1951_v34  }
  0xcf   :  { %47 = vmatpush.msra.mxu0 %v1871_v37 }
  0xd0   :  { %v150_v35 = vpop.permute.xlu1 %149 }
  0xd1   :  { %vm850_vm12 = vcmp.gt.f32.partialorder %v150_v35, 0.0  ;;  %48 = vmatpush.msra.mxu0 %v1862_v33 }
  0xd2   :  { %v1234_v36 = vsel %vm850_vm12, %v1913_v56, -inf }
  0xd3   :  { %v1359_v41 = vmax.f32 %v1358_v29, %v1234_v36  ;;  %49 = vmatpush.msra.mxu0 %v1847_v27 }
  0xd4   :  { %1651 = vset.pattern.permute.xlu0 %v1761_v10 }
  0xd5   :  { %v1960_v43 = vmax.f32 %v1359_v41, %v1235_v39  ;;  %50 = vmatpush.msra.mxu0 %v1854_v28 }
  0xd6   :  { %1589 = vset.pattern.permute.xlu1 %v1724_v2  ;;  %1590 = vset.pattern.permute.xlu2 %v1746_v7  ;;  %v1979_v53 = vpop.permute.xlu0 %507 }
  0xd7   :  { %51 = vmatpush.msra.mxu0 %v1842_v26 }
  0xd8   :  { %v187_v55 = vpop.permute.xlu2 %186 }
  0xd9   :  { %vm856_vm15 = vcmp.gt.f32.partialorder %v187_v55, 0.0  ;;  %52 = vmatpush.msra.mxu0 %v1968_v45 }
  0xda   :  { %v1240_v0 = vsel %vm856_vm15, %v1847_v27, -inf }
  0xdb   :  { %53 = vmatpush.msra.mxu0 %v1936_v63 }
  0xdc   :  { %204 = vperm.xlu0 %1651, %v1815_v19   ;;  %54 = vmatmul.f32.vlgmr.msra.gmra.mxu0 %v1732_v4 }
  0xde   :  { %271 = vperm.xlu1 %1589, %v1951_v34   ;;  %277 = vperm.xlu2 %1590, %v1951_v34  }
  0xe0   :  { %v163_v50 = vpop.permute.xlu1 %162 }
  0xe1   :  { %vm852_vm14 = vcmp.gt.f32.partialorder %v163_v50, 0.0 }
  0xe2   :  { %v1236_v51 = vsel %vm852_vm14, %v1936_v63, -inf }
  0xe3   :  { %v1370_v52 = vmax.f32 %v1236_v51, %v1237_v47 }
  0xe4   :  { %689 = vperm.xlu0 %1651, %v1945_v30  }
  0xe6   :  { %1591 = vset.pattern.permute.xlu1 %v1727_v3  ;;  %1592 = vset.pattern.permute.xlu2 %v1750_v8  ;;  %v1986_v22 = vpop.permute.xlu0 %537 }
  0xe8   :  { %v199_v25 = vpop.permute.xlu2 %198 }
  0xe9   :  { %vm858_vm1 = vcmp.gt.f32.partialorder %v199_v25, 0.0 }
  0xea   :  { %v1242_v36 = vsel %vm858_vm1, %v1871_v37, -inf }
  0xec   :  { %1656 = vset.pattern.permute.xlu0 %v1788_v15 }
  0xee   :  { %283 = vperm.xlu1 %1591, %v1951_v34   ;;  %289 = vperm.xlu2 %1592, %v1951_v34  }
  0xf0   :  { %v181_v58 = vpop.permute.xlu1 %180 }
  0xf1   :  { %vm855_vm0 = vcmp.gt.f32.partialorder %v181_v58, 0.0 }
  0xf2   :  { %v1239_v61 = vsel %vm855_vm0, %v1854_v28, -inf }
  0xf3   :  { %v1371_v23 = vmax.f32 %v1370_v52, %v1239_v61 }
  0xf4   :  { %234 = vperm.xlu0 %1656, %v1815_v19  }
  0xf5   :  { %v1372_v24 = vmax.f32 %v1371_v23, %v1240_v0  ;;  %v2036_v23 = vperm.slane %v1732_v4, 7 }
  0xf6   :  { %1593 = vset.pattern.permute.xlu1 %v1761_v10  ;;  %1594 = vset.pattern.permute.xlu2 %v1833_v21  ;;  %v1992_v29 = vpop.permute.xlu0 %568 }
  0xf7   :  { %2432 = vst [vmem:[#allocation5_spill] sm:$0xff] %v2036_v23 }
  0xf8   :  { %v217_v52 = vpop.permute.xlu2 %216 }
  0xf9   :  { %vm861_vm4 = vcmp.gt.f32.partialorder %v217_v52, 0.0 }
  0xfa   :  { %v1245_v58 = vsel %vm861_vm4, %v1892_v48, -inf }
  0xfc   :  { %719 = vperm.xlu0 %1656, %v1945_v30  }
  0xfe   :  { %301 = vperm.xlu1 %1593, %v1951_v34   ;;  %307 = vperm.xlu2 %1594, %v1951_v34  }
 0x100   :  { %v193_v19 = vpop.permute.xlu1 %192 }
 0x101   :  { %vm857_vm2 = vcmp.gt.f32.partialorder %v193_v19, 0.0 }
 0x102   :  { %v1241_v35 = vsel %vm857_vm2, %v1862_v33, -inf }
 0x103   :  { %v1373_v39 = vmax.f32 %v1372_v24, %v1241_v35 }
 0x104   :  { %1661 = vset.pattern.permute.xlu0 %v1809_v18 }
 0x105   :  { %v1374_v41 = vmax.f32 %v1373_v39, %v1242_v36 }
 0x106   :  { %1595 = vset.pattern.permute.xlu1 %v1773_v12  ;;  %v114_v47 = vpop.permute.xlu0 %113  ;;  %1596 = vset.pattern.permute.xlu2 %v1767_v11 }
 0x107   :  { %vm844_vm3 = vcmp.gt.f32.partialorder %v114_v47, 0.0 }
 0x108   :  { %v1228_v50 = vsel %vm844_vm3, %v2010_v44, -inf  ;;  %v229_v24 = vpop.permute.xlu2 %228 }
 0x109   :  { %v1361_v51 = vmax.f32 %v1960_v43, %v1228_v50  ;;  %vm863_vm6 = vcmp.gt.f32.partialorder %v229_v24, 0.0 }
 0x10c   :  { %71 = vperm.xlu0 %1661, %v1737_v5  }
 0x10e   :  { %313 = vperm.xlu1 %1595, %v1951_v34   ;;  %319 = vperm.xlu2 %1596, %v1951_v34   ;;  %v2029_v5 = vpop.permute.xlu0 %598 }
 0x10f   :  { %2431 = vst [vmem:[#allocation4_spill] sm:$0xff] %v2029_v5 }
 0x110   :  { %v211_v55 = vpop.permute.xlu1 %210 }
 0x111   :  { %vm860_vm5 = vcmp.gt.f32.partialorder %v211_v55, 0.0 }
 0x112   :  { %v1244_v43 = vsel %vm860_vm5, %v2010_v44, -inf  ;;  %vm1525_vm5 = vcmask 1041409  }
 0x113   :  { %v1375_v61 = vmax.f32 %v1374_v41, %v1244_v43  ;;  %v1247_v41 = vsel %vm863_vm6, %v1924_v59, -inf }
 0x114   :  { %265 = vperm.xlu0 %1661, %v1951_v34  }
 0x115   :  { %v1376_v0 = vmax.f32 %v1375_v61, %v1245_v58 }
 0x116   :  { %1597 = vset.pattern.permute.xlu1 %v1788_v15  ;;  %1598 = vset.pattern.permute.xlu2 %v1879_v40 }
 0x118   :  { %v247_v52 = vpop.permute.xlu2 %246 }
 0x119   :  { %vm866_vm9 = vcmp.gt.f32.partialorder %v247_v52, 0.0 }
 0x11a   :  { %v1250_v43 = vsel %vm866_vm9, %v1913_v56, -inf }
 0x11c   :  { %750 = vperm.xlu0 %1661, %v2036_v23  }
 0x11e   :  { %331 = vperm.xlu1 %1597, %v1951_v34   ;;  %v144_v25 = vpop.permute.xlu0 %143  ;;  %337 = vperm.xlu2 %1598, %v1951_v34  }
 0x11f   :  { %vm849_vm7 = vcmp.gt.f32.partialorder %v144_v25, 0.0 }
 0x120   :  { %v223_v19 = vpop.permute.xlu1 %222  ;;  %v1233_v35 = vsel %vm849_vm7, %v1999_v32, -inf }
 0x121   :  { %vm862_vm8 = vcmp.gt.f32.partialorder %v223_v19, 0.0  ;;  %v2045_v36 = vmax.f32 %v1361_v51, %v1233_v35 }
 0x122   :  { %v1246_v39 = vsel %vm862_vm8, %v1897_v49, -inf }
 0x123   :  { %v1377_v47 = vmax.f32 %v1376_v0, %v1246_v39 }
 0x124   :  { %1666 = vset.pattern.permute.xlu0 %v1758_v9 }
 0x125   :  { %v1378_v4 = vmax.f32 %v1377_v47, %v1247_v41 }
 0x126   :  { %1599 = vset.pattern.permute.xlu1 %v1800_v17  ;;  %1600 = vset.pattern.permute.xlu2 %v1779_v13  ;;  %v2053_v50 = vpop.permute.xlu0 %628 }
 0x127   :  { %2433 = vst [vmem:[#allocation6_spill] sm:$0xff] %v2053_v50 }
 0x12c   :  { %295 = vperm.xlu0 %1666, %v1951_v34  }
 0x12e   :  { %343 = vperm.xlu1 %1599, %v1951_v34   ;;  %349 = vperm.xlu2 %1600, %v1951_v34  }
 0x130   :  { %v241_v51 = vpop.permute.xlu1 %240 }
 0x131   :  { %vm865_vm10 = vcmp.gt.f32.partialorder %v241_v51, 0.0 }
 0x132   :  { %v1249_v55 = vsel %vm865_vm10, %v1999_v32, -inf }
 0x133   :  { %v1379_v58 = vmax.f32 %v1378_v4, %v1249_v55 }
 0x134   :  { %780 = vperm.xlu0 %1666, %v2036_v23  }
 0x135   :  { %v1380_v61 = vmax.f32 %v1379_v58, %v1250_v43  ;;  %v260_v58 = vpop.permute.xlu2 %259 }
 0x136   :  { %1601 = vset.pattern.permute.xlu1 %v1809_v18  ;;  %v175_v0 = vpop.permute.xlu0 %174  ;;  %1602 = vset.pattern.permute.xlu2 %v1724_v2  ;;  %vm868_vm0 = vcmp.gt.f32.partialorder %v260_v58, 0.0 }
 0x137   :  { %vm854_vm11 = vcmp.gt.f32.partialorder %v175_v0, 0.0 }
 0x138   :  { %v1238_v24 = vsel %vm854_vm11, %v1842_v26, -inf }
 0x139   :  { %v1381_v25 = vmax.f32 %v1380_v61, %v1238_v24 }
 0x13c   :  { %1671 = vset.pattern.permute.xlu0 %v1785_v14 }
 0x13d   :  { %v278_v24 = vpop.permute.xlu2 %277 }
 0x13e   :  { %362 = vperm.xlu1 %1601, %v1743_v6   ;;  %368 = vperm.xlu2 %1602, %v1743_v6   ;;  %v2068_v41 = vpop.permute.xlu0 %659  ;;  %vm871_vm3 = vcmp.gt.f32.partialorder %v278_v24, 0.0 }
 0x13f   :  { %2434 = vst [vmem:[#allocation7_spill] sm:$0xff] %v2068_v41 }
 0x140   :  { %v253_v19 = vpop.permute.xlu1 %252 }
 0x141   :  { %vm867_vm12 = vcmp.gt.f32.partialorder %v253_v19, 0.0 }
 0x142   :  { %v1251_v35 = vsel %vm867_vm12, %v1904_v54, -inf  ;;  %vm884_vm12 = vcmp.gt.f32.partialorder %v1915_v57, 0.0 }
 0x143   :  { %v1382_v39 = vmax.f32 %v1381_v25, %v1251_v35 }
 0x144   :  { %325 = vperm.xlu0 %1671, %v1951_v34  }
 0x146   :  { %1603 = vset.pattern.permute.xlu1 %v1746_v7  ;;  %1604 = vset.pattern.permute.xlu2 %v1727_v3 }
 0x14c   :  { %810 = vperm.xlu0 %1671, %v2036_v23  }
 0x14e   :  { %374 = vperm.xlu1 %1603, %v1743_v6   ;;  %v205_v47 = vpop.permute.xlu0 %204  ;;  %380 = vperm.xlu2 %1604, %v1743_v6  }
 0x14f   :  { %vm859_vm13 = vcmp.gt.f32.partialorder %v205_v47, 0.0 }
 0x150   :  { %v1243_v4 = vsel %vm859_vm13, %v1876_v38, -inf  ;;  %v272_v35 = vpop.permute.xlu1 %271 }
 0x151   :  { %v1383_v52 = vmax.f32 %v1382_v39, %v1243_v4  ;;  %vm870_vm1 = vcmp.gt.f32.partialorder %v272_v35, 0.0 }
 0x152   :  { %v1254_v58 = vsel %vm870_vm1, %v1842_v26, -inf }
 0x156   :  { %1606 = vset.pattern.permute.xlu1 %v1758_v9  ;;  %1607 = vset.pattern.permute.xlu2 %v1761_v10  ;;  %v2078_v34 = vpop.permute.xlu0 %689 }
 0x157   :  { %2435 = vst [vmem:[#allocation8_spill] sm:$0xff] %v2078_v34 }
 0x15e   :  { %392 = vperm.xlu1 %1606, %v1743_v6   ;;  %398 = vperm.xlu2 %1607, %v1743_v6  }
 0x160   :  { %v284_v34 = vpop.permute.xlu1 %283 }
 0x161   :  { %vm872_vm4 = vcmp.gt.f32.partialorder %v284_v34, 0.0 }
 0x162   :  { %v1256_v5 = vsel %vm872_vm4, %v1847_v27, -inf }
 0x166   :  { %1608 = vset.pattern.permute.xlu1 %v1833_v21  ;;  %v235_v51 = vpop.permute.xlu0 %234  ;;  %1609 = vset.pattern.permute.xlu2 %v1773_v12 }
 0x167   :  { %vm864_vm14 = vcmp.gt.f32.partialorder %v235_v51, 0.0  ;;  %v290_v51 = vpop.permute.xlu2 %289 }
 0x168   :  { %v1248_v55 = vsel %vm864_vm14, %v1929_v60, -inf  ;;  %vm873_vm6 = vcmp.gt.f32.partialorder %v290_v51, 0.0 }
 0x169   :  { %v1384_v43 = vmax.f32 %v1383_v52, %v1248_v55  ;;  %v1257_v34 = vsel %vm873_vm6, %v1862_v33, -inf }
 0x16b   :  { %v1385_v0 = vrot.slane %v1384_v43, 4 }
 0x16d   :  { %v1386_v25 = vmax.f32 %v1384_v43, %v1385_v0 }
 0x16e   :  { %404 = vperm.xlu1 %1608, %v1743_v6   ;;  %410 = vperm.xlu2 %1609, %v1743_v6   ;;  %v2087_v61 = vpop.permute.xlu0 %719 }
 0x16f   :  { %2436 = vst [vmem:[#allocation9_spill] sm:$0xff] %v2087_v61  ;;  %v1387_v47 = vrot.slane %v1386_v25, 2 }
 0x170   :  { %v302_v24 = vpop.permute.xlu1 %301 }
 0x171   :  { %v1388_v55 = vmax.f32 %v1386_v25, %v1387_v47  ;;  %vm875_vm7 = vcmp.gt.f32.partialorder %v302_v24, 0.0 }
 0x176   :  { %1611 = vset.pattern.permute.xlu1 %v1785_v14  ;;  %1612 = vset.pattern.permute.xlu2 %v1788_v15 }
 0x17e   :  { %422 = vperm.xlu1 %1611, %v1743_v6   ;;  %v72_v19 = vpop.permute.xlu0 %71  ;;  %428 = vperm.xlu2 %1612, %v1743_v6  }
 0x17f   :  { %vm837_vm15 = vcmp.gt.f32.partialorder %v72_v19, 0.0  ;;  %v1252_v19 = vsel %vm868_vm0, %v1936_v63, -inf }
 0x180   :  { %v1221_v39 = vsel %vm837_vm15, %v1968_v45, -inf }
 0x181   :  { %v1363_v4 = vmax.f32 %v2045_v36, %v1221_v39  ;;  %v1389_v36 = vrot.slane %v1388_v55, 1 }
 0x183   :  { %v1364_v52 = vrot.slane %v1363_v4, 4  ;;  %v1390_v35 = vmax.f32 %v1388_v55, %v1389_v36  ;;  %v1259_v36 = vsel %vm875_vm7, %v1876_v38, -inf  ;;  %vm1527_vm7 = vcmask 1042434  }
 0x185   :  { %v1365_v61 = vmax.f32 %v1363_v4, %v1364_v52  ;;  %v1255_v4 = vsel %vm871_vm3, %v1854_v28, -inf  ;;  %v308_v52 = vpop.permute.xlu2 %307 }
 0x186   :  { %1613 = vset.pattern.permute.xlu1 %v1879_v40  ;;  %v266_v43 = vpop.permute.xlu0 %265  ;;  %1614 = vset.pattern.permute.xlu2 %v1800_v17  ;;  %vm876_vm9 = vcmp.gt.f32.partialorder %v308_v52, 0.0 }
 0x187   :  { %vm869_vm2 = vcmp.gt.f32.partialorder %v266_v43, 0.0  ;;  %v1366_v0 = vrot.slane %v1365_v61, 2 }
 0x188   :  { %v1253_v41 = vsel %vm869_vm2, %v1968_v45, -inf }
 0x189   :  { %v1391_v39 = vmax.f32 %v1252_v19, %v1253_v41  ;;  %v1367_v23 = vmax.f32 %v1365_v61, %v1366_v0 }
 0x18b   :  { %v1392_v25 = vmax.f32 %v1391_v39, %v1254_v58  ;;  %v1368_v47 = vrot.slane %v1367_v23, 1 }
 0x18d   :  { %v1393_v43 = vmax.f32 %v1392_v25, %v1255_v4  ;;  %v1369_v50 = vmax.f32 %v1367_v23, %v1368_v47  ;;  %v320_v19 = vpop.permute.xlu2 %319  ;;  %v314_v23 = vpop.permute.xlu1 %313  ;;  %v1260_v25 = vsel %vm876_vm9, %v2010_v44, -inf }
 0x18e   :  { %434 = vperm.xlu1 %1613, %v1743_v6   ;;  %440 = vperm.xlu2 %1614, %v1743_v6   ;;  %v2107_v39 = vpop.permute.xlu0 %750  ;;  %vm877_vm10 = vcmp.gt.f32.partialorder %v314_v23, 0.0  ;;  %vm878_vm11 = vcmp.gt.f32.partialorder %v320_v19, 0.0  ;;  %v1268_v19 = vsel %vm884_vm12, %v1936_v63, -inf }
 0x18f   :  { %v1394_v41 = vmax.f32 %v1393_v43, %v1256_v5  ;;  %v2104_v61 = vsel %vm1525_vm5, %v1390_v35, %v1369_v50  ;;  %v1261_v35 = vsel %vm877_vm10, %v1892_v48, -inf  ;;  %vm889_vm5 = vcmp.gt.f32.partialorder %v1931_v62, 0.0 }
 0x191   :  { %v1395_v0 = vmax.f32 %v1394_v41, %v1257_v34  ;;  %v1262_v41 = vsel %vm878_vm11, %v1897_v49, -inf  ;;  %vm894_vm11 = vcmp.gt.f32.partialorder %v1947_v31, 0.0 }
 0x195   :  { %v338_v51 = vpop.permute.xlu2 %337  ;;  %v332_v6 = vpop.permute.xlu1 %331 }
 0x196   :  { %1616 = vset.pattern.permute.xlu1 %v1720_v1  ;;  %1617 = vset.pattern.permute.xlu2 %v1809_v18  ;;  %vm880_vm15 = vcmp.gt.f32.partialorder %v332_v6, 0.0  ;;  %vm881_vm1 = vcmp.gt.f32.partialorder %v338_v51, 0.0 }
 0x19d   :  { %v350_v47 = vpop.permute.xlu2 %349 }
 0x19e   :  { %453 = vperm.xlu1 %1616, %v1797_v16   ;;  %v296_v55 = vpop.permute.xlu0 %295  ;;  %459 = vperm.xlu2 %1617, %v1797_v16   ;;  %vm883_vm3 = vcmp.gt.f32.partialorder %v350_v47, 0.0 }
 0x19f   :  { %vm874_vm8 = vcmp.gt.f32.partialorder %v296_v55, 0.0  ;;  %v1267_v51 = vsel %vm883_vm3, %v1904_v54, -inf }
 0x1a0   :  { %v1258_v5 = vsel %vm874_vm8, %v1871_v37, -inf  ;;  %v344_v52 = vpop.permute.xlu1 %343 }
 0x1a1   :  { %v1396_v50 = vmax.f32 %v1395_v0, %v1258_v5  ;;  %vm882_vm2 = vcmp.gt.f32.partialorder %v344_v52, 0.0 }
 0x1a3   :  { %v1397_v58 = vmax.f32 %v1396_v50, %v1259_v36 }
 0x1a5   :  { %v1398_v4 = vmax.f32 %v1397_v58, %v1260_v25  ;;  %v369_v0 = vpop.permute.xlu2 %368 }
 0x1a6   :  { %1618 = vset.pattern.permute.xlu1 %v1724_v2  ;;  %1619 = vset.pattern.permute.xlu2 %v1746_v7  ;;  %v2120_v24 = vpop.permute.xlu0 %780  ;;  %vm886_vm13 = vcmp.gt.f32.partialorder %v369_v0, 0.0 }
 0x1a7   :  { %v1399_v43 = vmax.f32 %v1398_v4, %v1261_v35  ;;  %v1270_v5 = vsel %vm886_vm13, %v1842_v26, -inf  ;;  %v1264_v4 = vsel %vm880_vm15, %v1929_v60, -inf }
 0x1a9   :  { %v1400_v34 = vmax.f32 %v1399_v43, %v1262_v41  ;;  %v1265_v43 = vsel %vm881_vm1, %v1999_v32, -inf }
 0x1ad   :  { %v381_v41 = vpop.permute.xlu2 %380 }
 0x1ae   :  { %465 = vperm.xlu1 %1618, %v1797_v16   ;;  %471 = vperm.xlu2 %1619, %v1797_v16   ;;  %vm888_vm4 = vcmp.gt.f32.partialorder %v381_v41, 0.0 }
 0x1af   :  { %v1272_v47 = vsel %vm888_vm4, %v1847_v27, -inf  ;;  %vm1529_vm4 = vcmask 1043459  }
 0x1b0   :  { %v363_v23 = vpop.permute.xlu1 %362 }
 0x1b1   :  { %vm885_vm14 = vcmp.gt.f32.partialorder %v363_v23, 0.0 }
 0x1b2   :  { %v1269_v55 = vsel %vm885_vm14, %v1968_v45, -inf }
 0x1b3   :  { %v1412_v50 = vmax.f32 %v1268_v19, %v1269_v55  ;;  %v1266_v19 = vsel %vm882_vm2, %v1913_v56, -inf }
 0x1b5   :  { %v1413_v36 = vmax.f32 %v1412_v50, %v1270_v5  ;;  %v1273_v50 = vsel %vm889_vm5, %v1862_v33, -inf }
 0x1b6   :  { %1621 = vset.pattern.permute.xlu1 %v1750_v8  ;;  %v326_v58 = vpop.permute.xlu0 %325  ;;  %1622 = vset.pattern.permute.xlu2 %v1758_v9 }
 0x1b7   :  { %vm879_vm0 = vcmp.gt.f32.partialorder %v326_v58, 0.0 }
 0x1b8   :  { %v1263_v57 = vsel %vm879_vm0, %v1924_v59, -inf  ;;  %vm899_vm0 = vcmp.gt.f32.partialorder %v1958_v42, 0.0 }
 0x1b9   :  { %v1401_v25 = vmax.f32 %v1400_v34, %v1263_v57 }
 0x1bb   :  { %v1402_v35 = vmax.f32 %v1401_v25, %v1264_v4 }
 0x1bd   :  { %v1403_v0 = vmax.f32 %v1402_v35, %v1265_v43  ;;  %v399_v43 = vpop.permute.xlu2 %398 }
 0x1be   :  { %483 = vperm.xlu1 %1621, %v1797_v16   ;;  %489 = vperm.xlu2 %1622, %v1797_v16   ;;  %vm891_vm8 = vcmp.gt.f32.partialorder %v399_v43, 0.0 }
 0x1bf   :  { %v1404_v6 = vmax.f32 %v1403_v0, %v1266_v19 }
 0x1c0   :  { %v375_v34 = vpop.permute.xlu1 %374 }
 0x1c1   :  { %v1405_v52 = vmax.f32 %v1404_v6, %v1267_v51  ;;  %vm887_vm6 = vcmp.gt.f32.partialorder %v375_v34, 0.0  ;;  %v1275_v6 = vsel %vm891_vm8, %v1876_v38, -inf }
 0x1c2   :  { %v1271_v23 = vsel %vm887_vm6, %v1854_v28, -inf  ;;  %vm904_vm6 = vcmp.gt.f32.partialorder %v1972_v46, 0.0 }
 0x1c3   :  { %v1406_v55 = vrot.slane %v1405_v52, 4  ;;  %v1414_v5 = vmax.f32 %v1413_v36, %v1271_v23 }
 0x1c5   :  { %v1407_v58 = vmax.f32 %v1405_v52, %v1406_v55  ;;  %v1415_v57 = vmax.f32 %v1414_v5, %v1272_v47  ;;  %v1278_v5 = vsel %vm894_vm11, %v1897_v49, -inf  ;;  %vm909_vm11 = vcmp.gt.f32.partialorder %v1979_v53, 0.0 }
 0x1c6   :  { %1623 = vset.pattern.permute.xlu1 %v1761_v10  ;;  %1624 = vset.pattern.permute.xlu2 %v1833_v21 }
 0x1c7   :  { %v1408_v25 = vrot.slane %v1407_v58, 2  ;;  %v1416_v4 = vmax.f32 %v1415_v57, %v1273_v50 }
 0x1c8   :  { %v411_v52 = vpop.permute.xlu2 %410 }
 0x1c9   :  { %v1409_v35 = vmax.f32 %v1407_v58, %v1408_v25  ;;  %vm893_vm10 = vcmp.gt.f32.partialorder %v411_v52, 0.0 }
 0x1ca   :  { %v1277_v47 = vsel %vm893_vm10, %v1892_v48, -inf }
 0x1cb   :  { %v1410_v62 = vrot.slane %v1409_v35, 1 }
 0x1cd   :  { %v1411_v41 = vmax.f32 %v1409_v35, %v1410_v62 }
 0x1ce   :  { %495 = vperm.xlu1 %1623, %v1797_v16   ;;  %501 = vperm.xlu2 %1624, %v1797_v16  }
 0x1cf   :  { %v2146_v36 = vsel %vm1527_vm7, %v1411_v41, %v2104_v61 }
 0x1d0   :  { %v393_v0 = vpop.permute.xlu1 %392 }
 0x1d1   :  { %vm890_vm9 = vcmp.gt.f32.partialorder %v393_v0, 0.0 }
 0x1d2   :  { %v1274_v19 = vsel %vm890_vm9, %v1871_v37, -inf }
 0x1d3   :  { %v1417_v51 = vmax.f32 %v1416_v4, %v1274_v19 }
 0x1d5   :  { %v1418_v34 = vmax.f32 %v1417_v51, %v1275_v6  ;;  %v1283_v51 = vsel %vm899_vm0, %v1904_v54, -inf  ;;  %vm914_vm0 = vcmp.gt.f32.partialorder %v1986_v22, 0.0 }
 0x1d6   :  { %1626 = vset.pattern.permute.xlu1 %v1767_v11  ;;  %1627 = vset.pattern.permute.xlu2 %v1785_v14 }
 0x1d8   :  { %v429_v57 = vpop.permute.xlu2 %428 }
 0x1d9   :  { %vm896_vm13 = vcmp.gt.f32.partialorder %v429_v57, 0.0 }
 0x1da   :  { %v1280_v4 = vsel %vm896_vm13, %v1929_v60, -inf }
 0x1de   :  { %513 = vperm.xlu1 %1626, %v1797_v16   ;;  %519 = vperm.xlu2 %1627, %v1797_v16  }
 0x1e0   :  { %v405_v61 = vpop.permute.xlu1 %404 }
 0x1e1   :  { %vm892_vm12 = vcmp.gt.f32.partialorder %v405_v61, 0.0 }
 0x1e2   :  { %v1276_v23 = vsel %vm892_vm12, %v2010_v44, -inf }
 0x1e3   :  { %v1419_v55 = vmax.f32 %v1418_v34, %v1276_v23 }
 0x1e5   :  { %v1420_v50 = vmax.f32 %v1419_v55, %v1277_v47 }
 0x1e6   :  { %1628 = vset.pattern.permute.xlu1 %v1788_v15  ;;  %1629 = vset.pattern.permute.xlu2 %v1879_v40 }
 0x1e7   :  { %v1421_v58 = vmax.f32 %v1420_v50, %v1278_v5 }
 0x1e8   :  { %v441_v43 = vpop.permute.xlu2 %440 }
 0x1e9   :  { %vm898_vm15 = vcmp.gt.f32.partialorder %v441_v43, 0.0 }
 0x1ea   :  { %v1282_v19 = vsel %vm898_vm15, %v1913_v56, -inf }
 0x1ee   :  { %525 = vperm.xlu1 %1628, %v1797_v16   ;;  %531 = vperm.xlu2 %1629, %v1797_v16  }
 0x1f0   :  { %v423_v31 = vpop.permute.xlu1 %422 }
 0x1f1   :  { %vm895_vm14 = vcmp.gt.f32.partialorder %v423_v31, 0.0 }
 0x1f2   :  { %v1279_v25 = vsel %vm895_vm14, %v1924_v59, -inf }
 0x1f3   :  { %v1422_v35 = vmax.f32 %v1421_v58, %v1279_v25 }
 0x1f5   :  { %v1423_v62 = vmax.f32 %v1422_v35, %v1280_v4 }
 0x1f6   :  { %1631 = vset.pattern.permute.xlu1 %v1779_v13  ;;  %1632 = vset.pattern.permute.xlu2 %v1720_v1 }
 0x1f8   :  { %v460_v61 = vpop.permute.xlu2 %459 }
 0x1f9   :  { %vm901_vm2 = vcmp.gt.f32.partialorder %v460_v61, 0.0  ;;  %v1293_v61 = vsel %vm909_vm11, %v1892_v48, -inf }
 0x1fa   :  { %v1285_v55 = vsel %vm901_vm2, %v1968_v45, -inf }
 0x1fe   :  { %543 = vperm.xlu1 %1631, %v1797_v16   ;;  %550 = vperm.xlu2 %1632, %v1827_v20  }
 0x200   :  { %v435_v41 = vpop.permute.xlu1 %434 }
 0x201   :  { %vm897_vm1 = vcmp.gt.f32.partialorder %v435_v41, 0.0  ;;  %v1288_v41 = vsel %vm904_vm6, %v1847_v27, -inf  ;;  %vm919_vm6 = vcmp.gt.f32.partialorder %v1992_v29, 0.0  ;;  %v2241_v29 = vld [vmem:[%s2426_s0 + $0x18] sm:$0xff] }
 0x202   :  { %v1281_v0 = vsel %vm897_vm1, %v1999_v32, -inf }
 0x203   :  { %v1424_v6 = vmax.f32 %v1423_v62, %v1281_v0 }
 0x205   :  { %v1425_v34 = vmax.f32 %v1424_v6, %v1282_v19 }
 0x206   :  { %1633 = vset.pattern.permute.xlu1 %v1809_v18  ;;  %1634 = vset.pattern.permute.xlu2 %v1724_v2 }
 0x207   :  { %v1426_v16 = vmax.f32 %v1425_v34, %v1283_v51 }
 0x208   :  { %v472_v4 = vpop.permute.xlu2 %471 }
 0x209   :  { %v1427_v52 = vrot.slane %v1426_v16, 4  ;;  %vm903_vm5 = vcmp.gt.f32.partialorder %v472_v4, 0.0 }
 0x20a   :  { %v1287_v43 = vsel %vm903_vm5, %v1854_v28, -inf }
 0x20b   :  { %v1428_v23 = vmax.f32 %v1426_v16, %v1427_v52 }
 0x20d   :  { %v1429_v47 = vrot.slane %v1428_v23, 2 }
 0x20e   :  { %556 = vperm.xlu1 %1633, %v1827_v20   ;;  %562 = vperm.xlu2 %1634, %v1827_v20  }
 0x20f   :  { %v1430_v42 = vmax.f32 %v1428_v23, %v1429_v47 }
 0x210   :  { %v454_v5 = vpop.permute.xlu1 %453 }
 0x211   :  { %v1431_v50 = vrot.slane %v1430_v42, 1  ;;  %vm900_vm3 = vcmp.gt.f32.partialorder %v454_v5, 0.0 }
 0x212   :  { %v1284_v58 = vsel %vm900_vm3, %v1936_v63, -inf  ;;  %vm1531_vm3 = vcmask 1044484  }
 0x213   :  { %v1432_v57 = vmax.f32 %v1430_v42, %v1431_v50  ;;  %v1433_v31 = vmax.f32 %v1284_v58, %v1285_v55 }
 0x215   :  { %v2179_v25 = vsel %vm1529_vm4, %v1432_v57, %v2146_v36 }
 0x216   :  { %1637 = vset.pattern.permute.xlu1 %v1727_v3  ;;  %1638 = vset.pattern.permute.xlu2 %v1750_v8 }
 0x218   :  { %v490_v6 = vpop.permute.xlu2 %489 }
 0x219   :  { %vm906_vm8 = vcmp.gt.f32.partialorder %v490_v6, 0.0 }
 0x21a   :  { %v1290_v28 = vsel %vm906_vm8, %v1871_v37, -inf }
 0x21e   :  { %574 = vperm.xlu1 %1637, %v1827_v20   ;;  %580 = vperm.xlu2 %1638, %v1827_v20  }
 0x220   :  { %v466_v35 = vpop.permute.xlu1 %465 }
 0x221   :  { %vm902_vm7 = vcmp.gt.f32.partialorder %v466_v35, 0.0 }
 0x222   :  { %v1286_v62 = vsel %vm902_vm7, %v1842_v26, -inf }
 0x223   :  { %v1434_v36 = vmax.f32 %v1433_v31, %v1286_v62  ;;  %v1298_v31 = vsel %vm914_vm0, %v1913_v56, -inf }
 0x225   :  { %v1435_v0 = vmax.f32 %v1434_v36, %v1287_v43 }
 0x226   :  { %1639 = vset.pattern.permute.xlu1 %v1758_v9  ;;  %1640 = vset.pattern.permute.xlu2 %v1761_v10 }
 0x227   :  { %v1436_v19 = vmax.f32 %v1435_v0, %v1288_v41 }
 0x228   :  { %v502_v34 = vpop.permute.xlu2 %501 }
 0x229   :  { %vm908_vm10 = vcmp.gt.f32.partialorder %v502_v34, 0.0 }
 0x22a   :  { %v1292_v37 = vsel %vm908_vm10, %v2010_v44, -inf }
 0x22e   :  { %586 = vperm.xlu1 %1639, %v1827_v20   ;;  %592 = vperm.xlu2 %1640, %v1827_v20  }
 0x230   :  { %v484_v46 = vpop.permute.xlu1 %483 }
 0x231   :  { %vm905_vm9 = vcmp.gt.f32.partialorder %v484_v46, 0.0 }
 0x232   :  { %v1289_v26 = vsel %vm905_vm9, %v1862_v33, -inf }
 0x233   :  { %v1437_v51 = vmax.f32 %v1436_v19, %v1289_v26 }
 0x235   :  { %v1438_v27 = vmax.f32 %v1437_v51, %v1290_v28  ;;  %v2235_v28 = vld [vmem:[%s2426_s0 + $0x10] sm:$0xff] }
 0x236   :  { %1642 = vset.pattern.permute.xlu1 %v1773_v12  ;;  %1643 = vset.pattern.permute.xlu2 %v1767_v11 }
 0x238   :  { %v520_v42 = vpop.permute.xlu2 %519 }
 0x239   :  { %vm911_vm13 = vcmp.gt.f32.partialorder %v520_v42, 0.0 }
 0x23a   :  { %v1295_v55 = vsel %vm911_vm13, %v1924_v59, -inf }
 0x23e   :  { %604 = vperm.xlu1 %1642, %v1827_v20   ;;  %610 = vperm.xlu2 %1643, %v1827_v20  }
 0x240   :  { %v496_v16 = vpop.permute.xlu1 %495 }
 0x241   :  { %vm907_vm12 = vcmp.gt.f32.partialorder %v496_v16, 0.0 }
 0x242   :  { %v1291_v33 = vsel %vm907_vm12, %v1876_v38, -inf }
 0x243   :  { %v1439_v52 = vmax.f32 %v1438_v27, %v1291_v33  ;;  %v2251_v33 = vld [vmem:[%s2426_s0 + $0x20] sm:$0xff] }
 0x245   :  { %v1440_v23 = vmax.f32 %v1439_v52, %v1292_v37 }
 0x246   :  { %1644 = vset.pattern.permute.xlu1 %v1785_v14  ;;  %1645 = vset.pattern.permute.xlu2 %v1788_v15 }
 0x247   :  { %v1441_v47 = vmax.f32 %v1440_v23, %v1293_v61 }
 0x248   :  { %v532_v50 = vpop.permute.xlu2 %531 }
 0x249   :  { %vm913_vm15 = vcmp.gt.f32.partialorder %v532_v50, 0.0 }
 0x24a   :  { %v1297_v59 = vsel %vm913_vm15, %v1999_v32, -inf }
 0x24e   :  { %616 = vperm.xlu1 %1644, %v1827_v20   ;;  %622 = vperm.xlu2 %1645, %v1827_v20  }
 0x250   :  { %v514_v53 = vpop.permute.xlu1 %513 }
 0x251   :  { %vm910_vm14 = vcmp.gt.f32.partialorder %v514_v53, 0.0  ;;  %v2437_v53 = vld [vmem:[#allocation4_spill] sm:$0xff] }
 0x252   :  { %v1294_v38 = vsel %vm910_vm14, %v1897_v49, -inf  ;;  %vm924_vm11 = vcmp.gt.f32.partialorder %v2437_v53, 0.0 }
 0x253   :  { %v1442_v5 = vmax.f32 %v1441_v47, %v1294_v38  ;;  %v2268_v38 = vld [vmem:[%s2426_s0 + $0x30] sm:$0xff] }
 0x255   :  { %v1443_v48 = vmax.f32 %v1442_v5, %v1295_v55  ;;  %v2274_v5 = vld [vmem:[%s2426_s0 + $0x38] sm:$0xff] }
 0x256   :  { %1647 = vset.pattern.permute.xlu1 %v1800_v17  ;;  %1648 = vset.pattern.permute.xlu2 %v1779_v13 }
 0x258   :  { %v551_v62 = vpop.permute.xlu2 %550 }
 0x259   :  { %vm916_vm4 = vcmp.gt.f32.partialorder %v551_v62, 0.0 }
 0x25a   :  { %v1300_v46 = vsel %vm916_vm4, %v1936_v63, -inf }
 0x25e   :  { %634 = vperm.xlu1 %1647, %v1827_v20   ;;  %640 = vperm.xlu2 %1648, %v1827_v20  }
 0x260   :  { %v526_v58 = vpop.permute.xlu1 %525 }
 0x261   :  { %vm912_vm1 = vcmp.gt.f32.partialorder %v526_v58, 0.0  ;;  %v1308_v58 = vsel %vm924_vm11, %v2010_v44, -inf }
 0x262   :  { %v1296_v49 = vsel %vm912_vm1, %v1929_v60, -inf }
 0x263   :  { %v1444_v57 = vmax.f32 %v1443_v48, %v1296_v49 }
 0x265   :  { %v1445_v4 = vmax.f32 %v1444_v57, %v1297_v59 }
 0x266   :  { %1649 = vset.pattern.permute.xlu1 %v1720_v1  ;;  %1650 = vset.pattern.permute.xlu2 %v1809_v18 }
 0x267   :  { %v1446_v35 = vmax.f32 %v1445_v4, %v1298_v31  ;;  %v2285_v4 = vld [vmem:[%s2426_s0 + $0x48] sm:$0xff] }
 0x268   :  { %v563_v18 = vpop.permute.xlu2 %562 }
 0x269   :  { %vm918_vm5 = vcmp.gt.f32.partialorder %v563_v18, 0.0 }
 0x26a   :  { %v1302_v51 = vsel %vm918_vm5, %v2235_v28, -inf }
 0x26e   :  { %647 = vperm.xlu1 %1649, %v1945_v30   ;;  %653 = vperm.xlu2 %1650, %v1945_v30  }
 0x270   :  { %v544_v20 = vpop.permute.xlu1 %543 }
 0x271   :  { %vm915_vm2 = vcmp.gt.f32.partialorder %v544_v20, 0.0 }
 0x272   :  { %v1299_v22 = vsel %vm915_vm2, %v1904_v54, -inf }
 0x273   :  { %v1447_v60 = vmax.f32 %v1446_v35, %v1299_v22 }
 0x275   :  { %v1448_v43 = vrot.slane %v1447_v60, 4 }
 0x276   :  { %1652 = vset.pattern.permute.xlu1 %v1746_v7  ;;  %1653 = vset.pattern.permute.xlu2 %v1727_v3 }
 0x277   :  { %v1449_v56 = vmax.f32 %v1447_v60, %v1448_v43  ;;  %v2438_v43 = vld [vmem:[#allocation6_spill] sm:$0xff] }
 0x278   :  { %vm929_vm0 = vcmp.gt.f32.partialorder %v2438_v43, 0.0 }
 0x279   :  { %v1450_v36 = vrot.slane %v1449_v56, 2 }
 0x27b   :  { %v1451_v41 = vmax.f32 %v1449_v56, %v1450_v36  ;;  %v2302_v56 = vld [vmem:[%s2426_s0 + $0x58] sm:$0xff] }
 0x27d   :  { %v1452_v0 = vrot.slane %v1451_v41, 1 }
 0x27e   :  { %665 = vperm.xlu1 %1652, %v1945_v30   ;;  %671 = vperm.xlu2 %1653, %v1945_v30  }
 0x27f   :  { %v1453_v19 = vmax.f32 %v1451_v41, %v1452_v0  ;;  %v2308_v41 = vld [vmem:[%s2426_s0 + $0x60] sm:$0xff] }
 0x280   :  { %v557_v54 = vpop.permute.xlu1 %556 }
 0x281   :  { %vm917_vm7 = vcmp.gt.f32.partialorder %v557_v54, 0.0  ;;  %v2228_v6 = vsel %vm1531_vm3, %v1453_v19, %v2179_v25  ;;  %v1303_v25 = vsel %vm919_vm6, %v2241_v29, -inf  ;;  %v1313_v19 = vsel %vm929_vm0, %v1999_v32, -inf }
 0x282   :  { %v1301_v26 = vsel %vm917_vm7, %v1968_v45, -inf  ;;  %v581_v45 = vpop.permute.xlu2 %580  ;;  %vm1533_vm6 = vcmask 1045509  }
 0x283   :  { %v1454_v27 = vmax.f32 %v1300_v46, %v1301_v26  ;;  %vm921_vm8 = vcmp.gt.f32.partialorder %v581_v45, 0.0 }
 0x285   :  { %v1455_v34 = vmax.f32 %v1454_v27, %v1302_v51  ;;  %v2439_v51 = vld [vmem:[#allocation5_spill] sm:$0xff] }
 0x286   :  { %1654 = vset.pattern.permute.xlu1 %v1750_v8  ;;  %1655 = vset.pattern.permute.xlu2 %v1758_v9  ;;  %v2257_v9 = vld [vmem:[%s2426_s0 + $0x28] sm:$0xff] }
 0x287   :  { %v1456_v63 = vmax.f32 %v1455_v34, %v1303_v25  ;;  %v1305_v52 = vsel %vm921_vm8, %v2257_v9, -inf  ;;  %v2319_v25 = vld [vmem:[%s2426_s0 + $0x70] sm:$0xff] }
 0x28a   :  { %v593_v47 = vpop.permute.xlu2 %592 }
 0x28b   :  { %vm923_vm10 = vcmp.gt.f32.partialorder %v593_v47, 0.0 }
 0x28c   :  { %v1307_v48 = vsel %vm923_vm10, %v2274_v5, -inf }
 0x28e   :  { %677 = vperm.xlu1 %1654, %v1945_v30   ;;  %683 = vperm.xlu2 %1655, %v1945_v30  }
 0x290   :  { %v575_v16 = vpop.permute.xlu1 %574 }
 0x291   :  { %vm920_vm9 = vcmp.gt.f32.partialorder %v575_v16, 0.0 }
 0x292   :  { %v1304_v37 = vsel %vm920_vm9, %v2251_v33, -inf }
 0x293   :  { %v1457_v61 = vmax.f32 %v1456_v63, %v1304_v37 }
 0x295   :  { %v1458_v23 = vmax.f32 %v1457_v61, %v1305_v52 }
 0x296   :  { %1657 = vset.pattern.permute.xlu1 %v1833_v21  ;;  %1658 = vset.pattern.permute.xlu2 %v1773_v12 }
 0x298   :  { %v611_v57 = vpop.permute.xlu2 %610 }
 0x299   :  { %vm926_vm13 = vcmp.gt.f32.partialorder %v611_v57, 0.0 }
 0x29e   :  { %695 = vperm.xlu1 %1657, %v1945_v30   ;;  %701 = vperm.xlu2 %1658, %v1945_v30  }
 0x2a0   :  { %v587_v42 = vpop.permute.xlu1 %586 }
 0x2a1   :  { %vm922_vm12 = vcmp.gt.f32.partialorder %v587_v42, 0.0  ;;  %v2336_v42 = vld [vmem:[%s2426_s0 + $0x8] sm:$0xff] }
 0x2a2   :  { %v1306_v55 = vsel %vm922_vm12, %v2268_v38, -inf }
 0x2a3   :  { %v1459_v50 = vmax.f32 %v1458_v23, %v1306_v55  ;;  %v2440_v23 = vld [vmem:[#allocation7_spill] sm:$0xff] }
 0x2a4   :  { %vm934_vm5 = vcmp.gt.f32.partialorder %v2440_v23, 0.0 }
 0x2a5   :  { %v1460_v49 = vmax.f32 %v1459_v50, %v1307_v48  ;;  %v1318_v55 = vsel %vm934_vm5, %v2235_v28, -inf  ;;  %v2343_v48 = vld [vmem:[%s2426_s0] sm:$0xff]  ;;  %vm1535_vm5 = vcmask 1046534  }
 0x2a6   :  { %1659 = vset.pattern.permute.xlu1 %v1767_v11  ;;  %1660 = vset.pattern.permute.xlu2 %v1785_v14  ;;  %v2291_v14 = vld [vmem:[%s2426_s0 + $0x50] sm:$0xff] }
 0x2a7   :  { %v1461_v59 = vmax.f32 %v1460_v49, %v1308_v58  ;;  %v1310_v35 = vsel %vm926_vm13, %v2291_v14, -inf }
 0x2a8   :  { %v623_v60 = vpop.permute.xlu2 %622 }
 0x2a9   :  { %vm928_vm15 = vcmp.gt.f32.partialorder %v623_v60, 0.0 }
 0x2aa   :  { %v1312_v18 = vsel %vm928_vm15, %v2308_v41, -inf }
 0x2ae   :  { %707 = vperm.xlu1 %1659, %v1945_v30   ;;  %713 = vperm.xlu2 %1660, %v1945_v30  }
 0x2b0   :  { %v605_v31 = vpop.permute.xlu1 %604 }
 0x2b1   :  { %vm925_vm14 = vcmp.gt.f32.partialorder %v605_v31, 0.0 }
 0x2b2   :  { %v1309_v44 = vsel %vm925_vm14, %v2285_v4, -inf }
 0x2b3   :  { %v1462_v20 = vmax.f32 %v1461_v59, %v1309_v44 }
 0x2b5   :  { %v1463_v22 = vmax.f32 %v1462_v20, %v1310_v35 }
 0x2b6   :  { %1662 = vset.pattern.permute.xlu1 %v1879_v40  ;;  %1663 = vset.pattern.permute.xlu2 %v1800_v17 }
 0x2b8   :  { %v641_v26 = vpop.permute.xlu2 %640 }
 0x2b9   :  { %vm931_vm2 = vcmp.gt.f32.partialorder %v641_v26, 0.0 }
 0x2be   :  { %725 = vperm.xlu1 %1662, %v1945_v30   ;;  %731 = vperm.xlu2 %1663, %v1945_v30  }
 0x2c0   :  { %v617_v62 = vpop.permute.xlu1 %616 }
 0x2c1   :  { %vm927_vm1 = vcmp.gt.f32.partialorder %v617_v62, 0.0 }
 0x2c2   :  { %v1311_v36 = vsel %vm927_vm1, %v2302_v56, -inf }
 0x2c3   :  { %v1464_v0 = vmax.f32 %v1463_v22, %v1311_v36  ;;  %v2441_v22 = vld [vmem:[#allocation8_spill] sm:$0xff] }
 0x2c4   :  { %vm939_vm11 = vcmp.gt.f32.partialorder %v2441_v22, 0.0 }
 0x2c5   :  { %v1465_v54 = vmax.f32 %v1464_v0, %v1312_v18  ;;  %v1323_v36 = vsel %vm939_vm11, %v2274_v5, -inf }
 0x2c6   :  { %1664 = vset.pattern.permute.xlu1 %v1779_v13  ;;  %1665 = vset.pattern.permute.xlu2 %v1720_v1  ;;  %v2325_v1 = vld [vmem:[%s2426_s0 + $0x78] sm:$0xff] }
 0x2c7   :  { %v1466_v46 = vmax.f32 %v1465_v54, %v1313_v19  ;;  %v1315_v34 = vsel %vm931_vm2, %v2325_v1, -inf  ;;  %v1546_v19 = vld [vmem:[%s2427_s2] sm:$0xff] }
 0x2c8   :  { %v654_v37 = vpop.permute.xlu2 %653  ;;  %1681 = vrcp.f32 %v1546_v19 }
 0x2c9   :  { %vm933_vm4 = vcmp.gt.f32.partialorder %v654_v37, 0.0 }
 0x2ce   :  { %737 = vperm.xlu1 %1664, %v1945_v30   ;;  %744 = vperm.xlu2 %1665, %v2439_v51  }
 0x2d0   :  { %v635_v27 = vpop.permute.xlu1 %634 }
 0x2d1   :  { %vm930_vm3 = vcmp.gt.f32.partialorder %v635_v27, 0.0 }
 0x2d2   :  { %v1314_v32 = vsel %vm930_vm3, %v2319_v25, -inf }
 0x2d3   :  { %v1467_v30 = vmax.f32 %v1466_v46, %v1314_v32  ;;  %v1682_v46 = vpop.eup %1681  ;;  %v2442_v32 = vld [vmem:[#allocation9_spill] sm:$0xff] }
 0x2d4   :  { %vm944_vm0 = vcmp.gt.f32.partialorder %v2442_v32, 0.0 }
 0x2d5   :  { %v1468_v63 = vmax.f32 %v1467_v30, %v1315_v34 }
 0x2d6   :  { %1667 = vset.pattern.permute.xlu1 %v1724_v2  ;;  %1668 = vset.pattern.permute.xlu2 %v1746_v7  ;;  %v1317_v2 = vsel %vm933_vm4, %v2336_v42, -inf }
 0x2d7   :  { %v1469_v45 = vrot.slane %v1468_v63, 4 }
 0x2d8   :  { %v672_v57 = vpop.permute.xlu2 %671 }
 0x2d9   :  { %v1470_v16 = vmax.f32 %v1468_v63, %v1469_v45  ;;  %vm936_vm8 = vcmp.gt.f32.partialorder %v672_v57, 0.0 }
 0x2da   :  { %v1320_v35 = vsel %vm936_vm8, %v2251_v33, -inf }
 0x2db   :  { %v1471_v52 = vrot.slane %v1470_v16, 2 }
 0x2dd   :  { %v1472_v61 = vmax.f32 %v1470_v16, %v1471_v52  ;;  %v1328_v16 = vsel %vm944_vm0, %v2308_v41, -inf }
 0x2de   :  { %756 = vperm.xlu1 %1667, %v2439_v51   ;;  %762 = vperm.xlu2 %1668, %v2439_v51  }
 0x2df   :  { %v1473_v47 = vrot.slane %v1472_v61, 1 }
 0x2e0   :  { %v648_v7 = vpop.permute.xlu1 %647 }
 0x2e1   :  { %v1474_v53 = vmax.f32 %v1472_v61, %v1473_v47  ;;  %vm932_vm7 = vcmp.gt.f32.partialorder %v648_v7, 0.0  ;;  %v2392_v47 = vld [vmem:[%s2426_s0 + $0x68] sm:$0xff] }
 0x2e2   :  { %v1316_v50 = vsel %vm932_vm7, %v2343_v48, -inf }
 0x2e3   :  { %v1475_v58 = vmax.f32 %v1316_v50, %v1317_v2  ;;  %v2347_v49 = vsel %vm1533_vm6, %v1474_v53, %v2228_v6  ;;  %vm949_vm6 = vcmp.gt.f32.partialorder %v2107_v39, 0.0 }
 0x2e5   :  { %v1476_v59 = vmax.f32 %v1475_v58, %v1318_v55 }
 0x2e6   :  { %1669 = vset.pattern.permute.xlu1 %v1727_v3  ;;  %1670 = vset.pattern.permute.xlu2 %v1750_v8 }
 0x2e8   :  { %v684_v3 = vpop.permute.xlu2 %683 }
 0x2e9   :  { %vm938_vm10 = vcmp.gt.f32.partialorder %v684_v3, 0.0 }
 0x2ea   :  { %v1322_v62 = vsel %vm938_vm10, %v2268_v38, -inf }
 0x2ee   :  { %768 = vperm.xlu1 %1669, %v2439_v51   ;;  %774 = vperm.xlu2 %1670, %v2439_v51  }
 0x2f0   :  { %v666_v31 = vpop.permute.xlu1 %665 }
 0x2f1   :  { %vm935_vm9 = vcmp.gt.f32.partialorder %v666_v31, 0.0 }
 0x2f2   :  { %v1319_v44 = vsel %vm935_vm9, %v2241_v29, -inf }
 0x2f3   :  { %v1477_v20 = vmax.f32 %v1476_v59, %v1319_v44 }
 0x2f5   :  { %v1478_v6 = vmax.f32 %v1477_v20, %v1320_v35 }
 0x2f6   :  { %1672 = vset.pattern.permute.xlu1 %v1761_v10  ;;  %1673 = vset.pattern.permute.xlu2 %v1833_v21 }
 0x2f8   :  { %v702_v0 = vpop.permute.xlu2 %701 }
 0x2f9   :  { %vm941_vm14 = vcmp.gt.f32.partialorder %v702_v0, 0.0 }
 0x2fe   :  { %786 = vperm.xlu1 %1672, %v2439_v51   ;;  %792 = vperm.xlu2 %1673, %v2439_v51  }
 0x300   :  { %v678_v8 = vpop.permute.xlu1 %677 }
 0x301   :  { %vm937_vm12 = vcmp.gt.f32.partialorder %v678_v8, 0.0  ;;  %v1333_v8 = vsel %vm949_vm6, %v2336_v42, -inf  ;;  %vm1537_vm6 = vcmask 1047559  }
 0x302   :  { %v1321_v60 = vsel %vm937_vm12, %v2257_v9, -inf  ;;  %vm954_vm12 = vcmp.gt.f32.partialorder %v2120_v24, 0.0 }
 0x303   :  { %v1479_v43 = vmax.f32 %v1478_v6, %v1321_v60 }
 0x305   :  { %v1480_v10 = vmax.f32 %v1479_v43, %v1322_v62 }
 0x306   :  { %1674 = vset.pattern.permute.xlu1 %v1773_v12  ;;  %1675 = vset.pattern.permute.xlu2 %v1767_v11  ;;  %v1699_v12 = vmov 0   ;;  %v2375_v11 = vld [vmem:[%s2426_s0 + $0x40] sm:$0xff] }
 0x307   :  { %v1481_v21 = vmax.f32 %v1480_v10, %v1323_v36  ;;  %1680 = vset.pattern.permute.xlu0 %v1699_v12  ;;  %v811_v12 = vpop.permute.xlu0 %810 }
 0x308   :  { %v714_v26 = vpop.permute.xlu2 %713  ;;  %1550 = vperm.xlu0 %1680, %v1682_v46  }
 0x309   :  { %vm943_vm15 = vcmp.gt.f32.partialorder %v714_v26, 0.0 }
 0x30a   :  { %v1327_v63 = vsel %vm943_vm15, %v2302_v56, -inf }
 0x30e   :  { %798 = vperm.xlu1 %1674, %v2439_v51   ;;  %804 = vperm.xlu2 %1675, %v2439_v51  }
 0x310   :  { %v696_v18 = vpop.permute.xlu1 %695 }
 0x311   :  { %vm940_vm13 = vcmp.gt.f32.partialorder %v696_v18, 0.0 }
 0x312   :  { %v1324_v54 = vsel %vm940_vm13, %v2375_v11, -inf }
 0x313   :  { %v1482_v27 = vmax.f32 %v1481_v21, %v1324_v54 }
 0x316   :  { %1676 = vset.pattern.permute.xlu1 %v1788_v15  ;;  %1677 = vset.pattern.permute.xlu2 %v1879_v40  ;;  %v1325_v15 = vsel %vm941_vm14, %v2285_v4, -inf }
 0x317   :  { %v1483_v34 = vmax.f32 %v1482_v27, %v1325_v15 }
 0x318   :  { %v732_v23 = vpop.permute.xlu2 %731 }
 0x319   :  { %vm946_vm3 = vcmp.gt.f32.partialorder %v732_v23, 0.0 }
 0x31e   :  { %816 = vperm.xlu1 %1676, %v2439_v51   ;;  %822 = vperm.xlu2 %1677, %v2439_v51  }
 0x320   :  { %v708_v40 = vpop.permute.xlu1 %707 }
 0x321   :  { %vm942_vm1 = vcmp.gt.f32.partialorder %v708_v40, 0.0  ;;  %v55_v40 = vpop.f32.mrf.mxu0 }
 0x322   :  { %v1326_v30 = vsel %vm942_vm1, %v2291_v14, -inf  ;;  %vm959_vm1 = vcmp.gt.f32.partialorder %v811_v12, 0.0 }
 0x323   :  { %v1484_v45 = vmax.f32 %v1483_v34, %v1326_v30 }
 0x325   :  { %v1485_v37 = vmax.f32 %v1484_v45, %v1327_v63 }
 0x326   :  { %1678 = vset.pattern.permute.xlu1 %v1800_v17  ;;  %1679 = vset.pattern.permute.xlu2 %v1779_v13  ;;  %v1330_v17 = vsel %vm946_vm3, %v2319_v25, -inf }
 0x327   :  { %v1486_v52 = vmax.f32 %v1485_v37, %v1328_v16 }
 0x328   :  { %v745_v20 = vpop.permute.xlu2 %744 }
 0x329   :  { %vm948_vm7 = vcmp.gt.f32.partialorder %v745_v20, 0.0 }
 0x32a   :  { %v1332_v22 = vsel %vm948_vm7, %v2343_v48, -inf  ;;  %v1338_v48 = vsel %vm954_vm12, %v2268_v38, -inf }
 0x32b   :  { %v1496_v43 = vmax.f32 %v1332_v22, %v1333_v8 }
 0x32e   :  { %828 = vperm.xlu1 %1678, %v2439_v51   ;;  %834 = vperm.xlu2 %1679, %v2439_v51  }
 0x330   :  { %v726_v61 = vpop.permute.xlu1 %725 }
 0x331   :  { %vm945_vm2 = vcmp.gt.f32.partialorder %v726_v61, 0.0 }
 0x332   :  { %v1329_v2 = vsel %vm945_vm2, %v2392_v47, -inf }
 0x333   :  { %v1487_v7 = vmax.f32 %v1486_v52, %v1329_v2 }
 0x335   :  { %v1488_v53 = vmax.f32 %v1487_v7, %v1330_v17 }
 0x338   :  { %v763_v3 = vpop.permute.xlu2 %762 }
 0x339   :  { %vm951_vm9 = vcmp.gt.f32.partialorder %v763_v3, 0.0 }
 0x340   :  { %v738_v13 = vpop.permute.xlu1 %737 }
 0x341   :  { %vm947_vm4 = vcmp.gt.f32.partialorder %v738_v13, 0.0 }
 0x342   :  { %v1331_v55 = vsel %vm947_vm4, %v2325_v1, -inf }
 0x343   :  { %v1489_v51 = vmax.f32 %v1488_v53, %v1331_v55 }
 0x345   :  { %v1490_v50 = vrot.slane %v1489_v51, 4 }
 0x347   :  { %v1491_v58 = vmax.f32 %v1489_v51, %v1490_v50 }
 0x348   :  { %v775_v36 = vpop.permute.xlu2 %774 }
 0x349   :  { %v1492_v59 = vrot.slane %v1491_v58, 2  ;;  %vm953_vm11 = vcmp.gt.f32.partialorder %v775_v36, 0.0 }
 0x34a   :  { %v1337_v42 = vsel %vm953_vm11, %v2257_v9, -inf }
 0x34b   :  { %v1493_v57 = vmax.f32 %v1491_v58, %v1492_v59 }
 0x34d   :  { %v1494_v31 = vrot.slane %v1493_v57, 1 }
 0x34f   :  { %v1495_v44 = vmax.f32 %v1493_v57, %v1494_v31 }
 0x350   :  { %v757_v6 = vpop.permute.xlu1 %756 }
 0x351   :  { %v2398_v35 = vsel %vm1535_vm5, %v1495_v44, %v2347_v49  ;;  %vm950_vm8 = vcmp.gt.f32.partialorder %v757_v6, 0.0  ;;  %v1335_v49 = vsel %vm951_vm9, %v2241_v29, -inf }
 0x352   :  { %v1334_v60 = vsel %vm950_vm8, %v2235_v28, -inf }
 0x353   :  { %v1497_v10 = vmax.f32 %v1496_v43, %v1334_v60 }
 0x355   :  { %v1498_v18 = vmax.f32 %v1497_v10, %v1335_v49 }
 0x358   :  { %v793_v19 = vpop.permute.xlu2 %792 }
 0x359   :  { %vm956_vm14 = vcmp.gt.f32.partialorder %v793_v19, 0.0 }
 0x35a   :  { %v1340_v27 = vsel %vm956_vm14, %v2375_v11, -inf  ;;  %v1343_v11 = vsel %vm959_vm1, %v2302_v56, -inf }
 0x360   :  { %v769_v62 = vpop.permute.xlu1 %768 }
 0x361   :  { %vm952_vm10 = vcmp.gt.f32.partialorder %v769_v62, 0.0 }
 0x362   :  { %v1336_v21 = vsel %vm952_vm10, %v2251_v33, -inf }
 0x363   :  { %v1499_v0 = vmax.f32 %v1498_v18, %v1336_v21 }
 0x365   :  { %v1500_v28 = vmax.f32 %v1499_v0, %v1337_v42 }
 0x367   :  { %v1501_v29 = vmax.f32 %v1500_v28, %v1338_v48 }
 0x368   :  { %v805_v33 = vpop.permute.xlu2 %804 }
 0x369   :  { %vm958_vm0 = vcmp.gt.f32.partialorder %v805_v33, 0.0 }
 0x36a   :  { %v1342_v38 = vsel %vm958_vm0, %v2291_v14, -inf }
 0x370   :  { %v787_v39 = vpop.permute.xlu1 %786 }
 0x371   :  { %vm955_vm13 = vcmp.gt.f32.partialorder %v787_v39, 0.0 }
 0x372   :  { %v1339_v54 = vsel %vm955_vm13, %v2274_v5, -inf }
 0x373   :  { %v1502_v26 = vmax.f32 %v1501_v29, %v1339_v54 }
 0x375   :  { %v1503_v15 = vmax.f32 %v1502_v26, %v1340_v27 }
 0x378   :  { %v823_v5 = vpop.permute.xlu2 %822 }
 0x379   :  { %vm961_vm3 = vcmp.gt.f32.partialorder %v823_v5, 0.0 }
 0x37a   :  { %v1551_v24 = vpop.permute.xlu0 %1550  ;;  %v1345_v52 = vsel %vm961_vm3, %v2392_v47, -inf }
 0x37b   :  { %v1553_v32 = vmul.f32 %v1551_v24, %v55_v40 }
 0x37d   :  { %1556 = vst [vmem:[%s2428_s3 + $0x8] sm:$0xff] %v1553_v32 }
 0x380   :  { %v799_v46 = vpop.permute.xlu1 %798 }
 0x381   :  { %vm957_vm15 = vcmp.gt.f32.partialorder %v799_v46, 0.0 }
 0x382   :  { %v1341_v9 = vsel %vm957_vm15, %v2285_v4, -inf }
 0x383   :  { %v1504_v34 = vmax.f32 %v1503_v15, %v1341_v9 }
 0x385   :  { %v1505_v63 = vmax.f32 %v1504_v34, %v1342_v38 }
 0x387   :  { %v1506_v45 = vmax.f32 %v1505_v63, %v1343_v11 }
 0x388   :  { %v835_v16 = vpop.permute.xlu2 %834 }
 0x389   :  { %vm963_vm4 = vcmp.gt.f32.partialorder %v835_v16, 0.0 }
 0x38a   :  { %v1347_v2 = vsel %vm963_vm4, %v2325_v1, -inf }
 0x390   :  { %v817_v30 = vpop.permute.xlu1 %816 }
 0x391   :  { %vm960_vm2 = vcmp.gt.f32.partialorder %v817_v30, 0.0 }
 0x392   :  { %v1344_v4 = vsel %vm960_vm2, %v2308_v41, -inf }
 0x393   :  { %v1507_v37 = vmax.f32 %v1506_v45, %v1344_v4 }
 0x395   :  { %v1508_v61 = vmax.f32 %v1507_v37, %v1345_v52 }
 0x3a0   :  { %v829_v14 = vpop.permute.xlu1 %828 }
 0x3a1   :  { %vm962_vm5 = vcmp.gt.f32.partialorder %v829_v14, 0.0 }
 0x3a2   :  { %v1346_v23 = vsel %vm962_vm5, %v2319_v25, -inf }
 0x3a3   :  { %v1509_v7 = vmax.f32 %v1508_v61, %v1346_v23 }
 0x3a5   :  { %v1510_v17 = vmax.f32 %v1509_v7, %v1347_v2 }
 0x3a7   :  { %v1511_v13 = vrot.slane %v1510_v17, 4 }
 0x3a9   :  { %v1512_v56 = vmax.f32 %v1510_v17, %v1511_v13 }
 0x3ab   :  { %v1513_v53 = vrot.slane %v1512_v56, 2 }
 0x3ad   :  { %v1514_v41 = vmax.f32 %v1512_v56, %v1513_v53 }
 0x3af   :  { %v1515_v55 = vrot.slane %v1514_v41, 1 }
 0x3b1   :  { %v1516_v51 = vmax.f32 %v1514_v41, %v1515_v55 }
 0x3b3   :  { %v1538_v50 = vsel %vm1537_vm6, %v1516_v51, %v2398_v35 }
 0x3b4   :  { %1555 = vst [vmem:[%s2428_s3] sm:$0xff] %v1538_v50 }

</bundles_post_ra>
